<compile_context>
chip_gen: v6e
topology: v6e:2x2x1
jax: 0.10.0
libtpu: 0.0.40
codegen_flags: <defaults>
</compile_context>

<pallas_src>
import math
import functools

import jax
import jax.numpy as jnp
from jax.experimental import pallas as pl
from jax.experimental.pallas import tpu as pltpu

# Keep double-buffered per-step working sets under ~24 MiB so the same tile
# choices fit v7x (64 MiB physical / 32 MiB scoped default) as well as v5e/v6e,
# and request the scoped VMEM limit explicitly.
_VMEM_BUDGET = 24 * 1024 * 1024
_VMEM_LIMIT = 32 * 1024 * 1024

# Exact per-row reciprocal keeps attention_probs bit-accurate vs the reference
# softmax; flip to True to use the EUP vrcp approximation when ~1e-4 relative
# error on the returned probs is acceptable (same EUP-pressure win either way:
# tq reciprocals instead of tq*S divides).
_APPROX_RECIPROCAL = False

_TM_CANDS = (512, 256, 128)
_TNK_CANDS = (2048, 1536, 1024, 768, 512, 384, 256, 128)
_INV_SQRT2 = 1.0 / math.sqrt(2.0)


def _divisor_cands(dim, cands):
    out = [c for c in cands if c <= dim and dim % c == 0]
    return out if out else [dim]


def _select_tiles(M, N, K, itemsize, *, tn_fixed=None, extra_full_n_operands=0):
    """Pick (tm, tn, tk) minimizing grid steps under the VMEM budget.

    Prefers a single K tile (no f32 accumulator, no k grid axis) when it fits.
    extra_full_n_operands: extra (tm, tn)-shaped inputs resident per step
    (the residual in the fused LayerNorm kernel).
    tm is capped at 512 so M//tm stays large/even for the v7x 2-TC split.
    """
    tms = _divisor_cands(M, _TM_CANDS)
    tns = [tn_fixed] if tn_fixed is not None else _divisor_cands(N, (N,) + _TNK_CANDS)
    tks = _divisor_cands(K, (K,) + _TNK_CANDS)
    best = None
    for tm in tms:
        for tn in tns:
            for tk in tks:
                ksteps = K // tk
                acc_bytes = tm * tn * 4 if ksteps > 1 else 0
                vmem = (2 * (tm * tk + tk * tn) * itemsize
                        + 2 * (1 + extra_full_n_operands) * tm * tn * itemsize
                        + acc_bytes)
                steps = (M // tm) * (N // tn) * ksteps
                key = (vmem > _VMEM_BUDGET, steps, ksteps, vmem)
                if best is None or key < best[0]:
                    best = (key, (tm, tn, tk))
    return best[1]


# ---------------------------------------------------------------------------
# Kernel 1: tiled linear  y = act(x @ W + b)   (single-K and K-accumulating)
# ---------------------------------------------------------------------------
def _apply_act_and_store(h, o_ref, act):
    if act == "gelu":  # erf formulation, matches the PyTorch gelu()
        h = h * 0.5 * (1.0 + jax.lax.erf(h * _INV_SQRT2))
    o_ref[...] = h.reshape(o_ref.shape).astype(o_ref.dtype)


def _linear_kernel_1k(x_ref, w_ref, b_ref, o_ref, *, act):
    h = jnp.dot(x_ref[...], w_ref[...], preferred_element_type=jnp.float32)
    _apply_act_and_store(h + b_ref[...].astype(jnp.float32), o_ref, act)


def _linear_kernel_acc(x_ref, w_ref, b_ref, o_ref, acc_ref, *, act):
    @pl.when(pl.program_id(2) == 0)
    def _():
        acc_ref[...] = jnp.zeros_like(acc_ref)

    acc_ref[...] += jnp.dot(x_ref[...], w_ref[...],
                            preferred_element_type=jnp.float32)

    @pl.when(pl.program_id(2) == pl.num_programs(2) - 1)
    def _():
        _apply_act_and_store(acc_ref[...] + b_ref[...].astype(jnp.float32),
                             o_ref, act)


def _linear(x, w_t, b, *, act=None, out_dtype=None):
    M, K = x.shape
    N = w_t.shape[1]
    out_dtype = out_dtype or x.dtype
    itemsize = jnp.dtype(x.dtype).itemsize
    tm, tn, tk = _select_tiles(M, N, K, itemsize)
    if tk == K:                       # single K tile: no acc, no k grid axis
        grid = (M // tm, N // tn)
        kernel = functools.partial(_linear_kernel_1k, act=act)
        in_specs = [pl.BlockSpec((tm, tk), lambda m, n: (m, 0)),
                    pl.BlockSpec((tk, tn), lambda m, n: (0, n)),
                    pl.BlockSpec((1, tn), lambda m, n: (0, n))]
        out_specs = pl.BlockSpec((tm, tn), lambda m, n: (m, n))
        scratch = []
        sem = ("parallel", "parallel")
    else:
        grid = (M // tm, N // tn, K // tk)
        kernel = functools.partial(_linear_kernel_acc, act=act)
        in_specs = [pl.BlockSpec((tm, tk), lambda m, n, k: (m, k)),
                    pl.BlockSpec((tk, tn), lambda m, n, k: (k, n)),
                    pl.BlockSpec((1, tn), lambda m, n, k: (0, n))]
        out_specs = pl.BlockSpec((tm, tn), lambda m, n, k: (m, n))
        scratch = [pltpu.VMEM((tm, tn), jnp.float32)]
        sem = ("parallel", "parallel", "arbitrary")
    return pl.pallas_call(
        kernel,
        out_shape=jax.ShapeDtypeStruct((M, N), out_dtype),
        grid_spec=pltpu.PrefetchScalarGridSpec(
            num_scalar_prefetch=0, grid=grid,
            in_specs=in_specs, out_specs=out_specs, scratch_shapes=scratch),
        compiler_params=pltpu.CompilerParams(
            dimension_semantics=sem, vmem_limit_bytes=_VMEM_LIMIT),
        cost_estimate=pl.CostEstimate(
            flops=2 * M * N * K,
            transcendentals=M * N if act == "gelu" else 0,
            bytes_accessed=(M * K + K * N + M * N) * itemsize),
    )(x, w_t, b[None, :])


def _qkv_linear(x, wqkv_t, bqkv, *, hidden):
    """Fused QKV projection emitted directly in (3, M, H) layout so attention
    can select q/k/v purely via index_maps (no XLA split / transpose)."""
    M, K = x.shape
    N = wqkv_t.shape[1]
    itemsize = jnp.dtype(x.dtype).itemsize
    tm, tn, tk = _select_tiles(M, N, K, itemsize, tn_fixed=hidden)
    if tk == K:
        grid = (M // tm, N // tn)
        kernel = functools.partial(_linear_kernel_1k, act=None)
        in_specs = [pl.BlockSpec((tm, tk), lambda m, n: (m, 0)),
                    pl.BlockSpec((tk, tn), lambda m, n: (0, n)),
                    pl.BlockSpec((1, tn), lambda m, n: (0, n))]
        out_specs = pl.BlockSpec((1, tm, tn), lambda m, n: (n, m, 0))
        scratch = []
        sem = ("parallel", "parallel")
    else:
        grid = (M // tm, N // tn, K // tk)
        kernel = functools.partial(_linear_kernel_acc, act=None)
        in_specs = [pl.BlockSpec((tm, tk), lambda m, n, k: (m, k)),
                    pl.BlockSpec((tk, tn), lambda m, n, k: (k, n)),
                    pl.BlockSpec((1, tn), lambda m, n, k: (0, n))]
        out_specs = pl.BlockSpec((1, tm, tn), lambda m, n, k: (n, m, 0))
        scratch = [pltpu.VMEM((tm, tn), jnp.float32)]
        sem = ("parallel", "parallel", "arbitrary")
    return pl.pallas_call(
        kernel,
        out_shape=jax.ShapeDtypeStruct((3, M, hidden), x.dtype),
        grid_spec=pltpu.PrefetchScalarGridSpec(
            num_scalar_prefetch=0, grid=grid,
            in_specs=in_specs, out_specs=out_specs, scratch_shapes=scratch),
        compiler_params=pltpu.CompilerParams(
            dimension_semantics=sem, vmem_limit_bytes=_VMEM_LIMIT),
        cost_estimate=pl.CostEstimate(
            flops=2 * M * N * K, transcendentals=0,
            bytes_accessed=(M * K + K * N + M * N) * itemsize),
    )(x, wqkv_t, bqkv[None, :])


# ---------------------------------------------------------------------------
# Kernel 2: tiled linear + bias + residual + LayerNorm (full hidden per tile)
# ---------------------------------------------------------------------------
def _res_ln_store(h, res_ref, b_ref, g_ref, beta_ref, o_ref, eps):
    h = h + b_ref[...].astype(jnp.float32) + res_ref[...].astype(jnp.float32)
    mu = jnp.mean(h, axis=-1, keepdims=True)
    d = h - mu                                   # reused for variance + output
    var = jnp.mean(d * d, axis=-1, keepdims=True)
    g = g_ref[...].astype(jnp.float32)
    bb = beta_ref[...].astype(jnp.float32)
    o_ref[...] = (d * jax.lax.rsqrt(var + eps) * g + bb).astype(o_ref.dtype)


def _linear_res_ln_kernel_1k(x_ref, w_ref, b_ref, res_ref, g_ref, beta_ref,
                             o_ref, *, eps):
    h = jnp.dot(x_ref[...], w_ref[...], preferred_element_type=jnp.float32)
    _res_ln_store(h, res_ref, b_ref, g_ref, beta_ref, o_ref, eps)


def _linear_res_ln_kernel_acc(x_ref, w_ref, b_ref, res_ref, g_ref, beta_ref,
                              o_ref, acc_ref, *, eps):
    @pl.when(pl.program_id(1) == 0)
    def _():
        acc_ref[...] = jnp.zeros_like(acc_ref)

    acc_ref[...] += jnp.dot(x_ref[...], w_ref[...],
                            preferred_element_type=jnp.float32)

    @pl.when(pl.program_id(1) == pl.num_programs(1) - 1)
    def _():
        _res_ln_store(acc_ref[...], res_ref, b_ref, g_ref, beta_ref, o_ref, eps)


def _linear_residual_layernorm(x, w_t, b, residual, gamma, beta, *, eps=1e-12):
    M, K = x.shape
    N = w_t.shape[1]
    itemsize = jnp.dtype(x.dtype).itemsize
    tm, _, tk = _select_tiles(M, N, K, itemsize, tn_fixed=N,
                              extra_full_n_operands=1)
    if tk == K:
        grid = (M // tm,)
        kernel = functools.partial(_linear_res_ln_kernel_1k, eps=eps)
        in_specs = [pl.BlockSpec((tm, tk), lambda m: (m, 0)),
                    pl.BlockSpec((tk, N), lambda m: (0, 0)),
                    pl.BlockSpec((1, N), lambda m: (0, 0)),
                    pl.BlockSpec((tm, N), lambda m: (m, 0)),
                    pl.BlockSpec((1, N), lambda m: (0, 0)),
                    pl.BlockSpec((1, N), lambda m: (0, 0))]
        out_specs = pl.BlockSpec((tm, N), lambda m: (m, 0))
        scratch = []
        sem = ("parallel",)
    else:
        grid = (M // tm, K // tk)
        kernel = functools.partial(_linear_res_ln_kernel_acc, eps=eps)
        in_specs = [pl.BlockSpec((tm, tk), lambda m, k: (m, k)),
                    pl.BlockSpec((tk, N), lambda m, k: (k, 0)),
                    pl.BlockSpec((1, N), lambda m, k: (0, 0)),
                    pl.BlockSpec((tm, N), lambda m, k: (m, 0)),
                    pl.BlockSpec((1, N), lambda m, k: (0, 0)),
                    pl.BlockSpec((1, N), lambda m, k: (0, 0))]
        out_specs = pl.BlockSpec((tm, N), lambda m, k: (m, 0))
        scratch = [pltpu.VMEM((tm, N), jnp.float32)]
        sem = ("parallel", "arbitrary")
    return pl.pallas_call(
        kernel,
        out_shape=jax.ShapeDtypeStruct((M, N), residual.dtype),
        grid_spec=pltpu.PrefetchScalarGridSpec(
            num_scalar_prefetch=0, grid=grid,
            in_specs=in_specs, out_specs=out_specs, scratch_shapes=scratch),
        compiler_params=pltpu.CompilerParams(
            dimension_semantics=sem, vmem_limit_bytes=_VMEM_LIMIT),
        cost_estimate=pl.CostEstimate(
            flops=2 * M * N * K, transcendentals=0,
            bytes_accessed=(M * K + K * N + 2 * M * N) * itemsize),
    )(x, w_t, b[None, :], residual, gamma[None, :], beta[None, :])


# ---------------------------------------------------------------------------
# Kernel 3: attention — grid (B, S//tq), all heads per step (in-kernel slices)
# ---------------------------------------------------------------------------
def _attention_kernel(q_ref, k_ref, v_ref, m_ref, *o_refs,
                      num_heads, head_dim, scale, with_probs):
    if with_probs:
        probs_ref, ctx_ref = o_refs
    else:
        (ctx_ref,) = o_refs
    mask = m_ref[0].astype(jnp.float32)                    # [1, S]
    for h in range(num_heads):        # unrolled: chains NH MXU matmuls / step
        hs = pl.ds(h * head_dim, head_dim)
        qh = q_ref[0, 0, :, hs]                            # [tq, hd]
        kh = k_ref[0, 0, :, hs]                            # [S,  hd]
        s = jax.lax.dot_general(qh, kh, (((1,), (1,)), ((), ())),
                                preferred_element_type=jnp.float32)
        s = s * scale + mask
        p = jnp.exp(s - jnp.max(s, axis=-1, keepdims=True))
        # tq reciprocals + a VPU multiply instead of tq*S EUP divides.
        inv = pl.reciprocal(jnp.sum(p, axis=-1, keepdims=True),
                            approx=_APPROX_RECIPROCAL)
        p = p * inv
        pv = p.astype(v_ref.dtype)    # single cast, reused for probs + PV
        if with_probs:
            probs_ref[0, h] = (pv if probs_ref.dtype == v_ref.dtype
                               else p.astype(probs_ref.dtype))
        ctx = jnp.dot(pv, v_ref[0, 0, :, hs],
                      preferred_element_type=jnp.float32)
        ctx_ref[0, :, hs] = ctx.astype(ctx_ref.dtype)


def _select_tq(S, H, num_heads, itemsize, with_probs):
    cands = [c for c in (512, 256, 128) if c <= S and S % c == 0] or [S]
    for tq in cands:
        probs_bytes = num_heads * tq * S * itemsize if with_probs else 0
        vmem = 2 * (itemsize * (2 * tq * H + 2 * S * H) + probs_bytes)
        if vmem <= _VMEM_BUDGET:
            return tq
    return cands[-1]


def _attention(qkv3, mask_b1s, *, num_heads, with_probs=True):
    _, B, S, H = qkv3.shape                                # (3, B, S, H)
    hd = H // num_heads
    scale = 1.0 / math.sqrt(hd)
    itemsize = jnp.dtype(qkv3.dtype).itemsize
    tq = _select_tq(S, H, num_heads, itemsize, with_probs)
    grid = (B, S // tq)

    in_specs = [
        pl.BlockSpec((1, 1, tq, H), lambda b, qi: (0, b, qi, 0)),   # Q rows
        pl.BlockSpec((1, 1, S, H), lambda b, qi: (1, b, 0, 0)),     # K (all rows)
        pl.BlockSpec((1, 1, S, H), lambda b, qi: (2, b, 0, 0)),     # V (all rows)
        pl.BlockSpec((1, 1, S), lambda b, qi: (b, 0, 0)),           # additive mask
    ]
    ctx_sds = jax.ShapeDtypeStruct((B, S, H), qkv3.dtype)
    ctx_spec = pl.BlockSpec((1, tq, H), lambda b, qi: (b, qi, 0))
    if with_probs:
        out_shape = (jax.ShapeDtypeStruct((B, num_heads, S, S), qkv3.dtype),
                     ctx_sds)
        out_specs = (pl.BlockSpec((1, num_heads, tq, S),
                                  lambda b, qi: (b, 0, qi, 0)),
                     ctx_spec)
    else:
        out_shape = ctx_sds
        out_specs = ctx_spec

    outs = pl.pallas_call(
        functools.partial(_attention_kernel, num_heads=num_heads, head_dim=hd,
                          scale=scale, with_probs=with_probs),
        out_shape=out_shape,
        grid_spec=pltpu.PrefetchScalarGridSpec(
            num_scalar_prefetch=0, grid=grid,
            in_specs=in_specs, out_specs=out_specs),
        compiler_params=pltpu.CompilerParams(
            dimension_semantics=("parallel", "parallel"),
            vmem_limit_bytes=_VMEM_LIMIT),
        cost_estimate=pl.CostEstimate(
            flops=4 * B * num_heads * S * S * hd,
            transcendentals=B * num_heads * S * S,
            bytes_accessed=itemsize * (4 * B * S * H
                                       + (B * num_heads * S * S
                                          if with_probs else 0))),
    )(qkv3, qkv3, qkv3, mask_b1s)
    if with_probs:
        probs, ctx = outs
    else:
        probs, ctx = None, outs
    return ctx, probs


# ---------------------------------------------------------------------------
# BertLayer forward
# ---------------------------------------------------------------------------
def prepare_params(params):
    """One-time (outside jit) weight preparation: transpose PyTorch [out,in]
    Linear weights to [in,out] and fuse Q/K/V, so no transposes/concats sit on
    the per-call critical path."""
    return dict(
        wqkv_t=jnp.concatenate([params["wq"].T, params["wk"].T,
                                params["wv"].T], axis=1),          # [H, 3H]
        bqkv=jnp.concatenate([params["bq"], params["bk"], params["bv"]]),
        wo_t=params["wo"].T, bo=params["bo"],
        ln1_g=params["ln1_g"], ln1_b=params["ln1_b"],
        wi_t=params["wi"].T, bi=params["bi"],
        wo2_t=params["wo2"].T, bo2=params["bo2"],
        ln2_g=params["ln2_g"], ln2_b=params["ln2_b"],
    )


@functools.partial(jax.jit, static_argnames=("num_heads", "return_probs"))
def bert_layer(hidden_states, attention_mask, prepared_params, *, num_heads,
               return_probs=True):
    """attention_mask: additive mask broadcastable to [B,1,1,S] (standard BERT
    extended mask). Per-query masks ([B,1,S,S]) are not supported."""
    p = prepared_params
    B, S, H = hidden_states.shape
    M = B * S
    x2 = hidden_states.reshape(M, H)

    if H % 128 == 0:
        # Fused QKV projection emitted directly in (3, B*S, H) layout.
        qkv = _qkv_linear(x2, p["wqkv_t"], p["bqkv"], hidden=H)
        qkv3 = qkv.reshape(3, B, S, H)
    else:
        # Unaligned/tiny hidden sizes: lane blocks narrower than 128 that don't
        # span the full array aren't supported, so fall back to an XLA split.
        qkv = _linear(x2, p["wqkv_t"], p["bqkv"])
        q, k, v = jnp.split(qkv, 3, axis=1)
        qkv3 = jnp.stack([q, k, v]).reshape(3, B, S, H)

    mask = jnp.broadcast_to(attention_mask, (B, 1, 1, S)).reshape(B, 1, S)
    ctx, probs = _attention(qkv3, mask, num_heads=num_heads,
                            with_probs=return_probs)

    # BertSelfOutput: dense + (dropout: identity) + LayerNorm(h + input)
    attn_out = _linear_residual_layernorm(
        ctx.reshape(M, H), p["wo_t"], p["bo"], x2, p["ln1_g"], p["ln1_b"])

    # BertIntermediate: dense + erf-gelu
    inter = _linear(attn_out, p["wi_t"], p["bi"], act="gelu")

    # BertOutput: dense + (dropout: identity) + LayerNorm(h + attention_output)
    layer_out = _linear_residual_layernorm(
        inter, p["wo2_t"], p["bo2"], attn_out, p["ln2_g"], p["ln2_b"])

    return layer_out.reshape(B, S, H), probs


# ---------------------------------------------------------------------------
# Pure-JAX reference (mirrors the PyTorch module, eval mode)
# ---------------------------------------------------------------------------
def reference(x, mask, params, num_heads):
    B, S, H = x.shape
    hd = H // num_heads

    def lin(t, w, b):
        return t @ w.T + b

    def sh(t):
        return t.reshape(B, S, num_heads, hd).transpose(0, 2, 1, 3)

    qh = sh(lin(x, params["wq"], params["bq"]))
    kh = sh(lin(x, params["wk"], params["bk"]))
    vh = sh(lin(x, params["wv"], params["bv"]))
    scores = jnp.einsum("bhqd,bhkd->bhqk", qh, kh) / math.sqrt(hd)
    scores = scores + mask
    probs = jax.nn.softmax(scores, axis=-1)
    ctx = jnp.einsum("bhqk,bhkd->bhqd", probs, vh)
    ctx = ctx.transpose(0, 2, 1, 3).reshape(B, S, H)

    def ln(t, g, b_):
        mu = jnp.mean(t, axis=-1, keepdims=True)
        var = jnp.mean((t - mu) ** 2, axis=-1, keepdims=True)
        return (t - mu) / jnp.sqrt(var + 1e-12) * g + b_

    attn_out = ln(lin(ctx, params["wo"], params["bo"]) + x,
                  params["ln1_g"], params["ln1_b"])
    h = lin(attn_out, params["wi"], params["bi"])
    h = h * 0.5 * (1.0 + jax.lax.erf(h / math.sqrt(2.0)))
    layer_out = ln(lin(h, params["wo2"], params["bo2"]) + attn_out,
                   params["ln2_g"], params["ln2_b"])
    return layer_out, probs


if __name__ == "__main__":
    # Small, layout-aligned config: batch=2, seq=8, hidden=128, heads=4, ffn=512.
    B, S, H, NH, I = 2, 8, 128, 4, 512
    key = jax.random.PRNGKey(0)
    ks = jax.random.split(key, 16)

    def rn(kk, shape, s=0.05):
        return s * jax.random.normal(kk, shape, dtype=jnp.float32)

    raw = dict(
        wq=rn(ks[0], (H, H)), bq=rn(ks[1], (H,)),
        wk=rn(ks[2], (H, H)), bk=rn(ks[3], (H,)),
        wv=rn(ks[4], (H, H)), bv=rn(ks[5], (H,)),
        wo=rn(ks[6], (H, H)), bo=rn(ks[7], (H,)),
        ln1_g=jnp.ones((H,), jnp.float32), ln1_b=jnp.zeros((H,), jnp.float32),
        wi=rn(ks[8], (I, H)), bi=rn(ks[9], (I,)),
        wo2=rn(ks[10], (H, I)), bo2=rn(ks[11], (H,)),
        ln2_g=jnp.ones((H,), jnp.float32), ln2_b=jnp.zeros((H,), jnp.float32),
    )
    x = jax.random.normal(ks[12], (B, S, H), dtype=jnp.float32)
    # Standard BERT extended attention mask: 0 for keep, -10000 for masked.
    keep = (jax.random.uniform(ks[13], (B, S)) > 0.1).astype(jnp.float32)
    mask = (1.0 - keep)[:, None, None, :] * -10000.0

    params = prepare_params(raw)
    out, probs = bert_layer(x, mask, params, num_heads=NH, return_probs=True)
    out = jax.block_until_ready(out)
    probs = jax.block_until_ready(probs)

    ref_out, ref_probs = reference(x, mask, raw, NH)
    assert out.shape == (B, S, H), out.shape
    assert probs.shape == (B, NH, S, S), probs.shape
    err_out = float(jnp.max(jnp.abs(out - ref_out)))
    err_prb = float(jnp.max(jnp.abs(probs - ref_probs)))
    assert err_out < 1e-4 and err_prb < 1e-5, (err_out, err_prb)

    print("KERNEL_OK")
</pallas_src>

<mosaic_0001>
module attributes {stable_mosaic.version = 11 : i64} {
  func.func @_linear_kernel_1k(%arg0: i32, %arg1: i32, %arg2: memref<16x128xf32, #tpu.memory_space<vmem>>, %arg3: memref<128x128xf32, #tpu.memory_space<vmem>>, %arg4: memref<1x128xf32, #tpu.memory_space<vmem>>, %arg5: memref<1x16x128xf32, #tpu.memory_space<vmem>>) attributes {dimension_semantics = [#tpu.dimension_semantics<parallel>, #tpu.dimension_semantics<parallel>], iteration_bounds = array<i64: 1, 3>, scalar_prefetch = 0 : i64, scratch_operands = 0 : i64, tpu.core_type = #tpu.core_type<tc>, window_params = [{transform_indices = @transform_0, window_bounds = array<i64: 16, 128>}, {transform_indices = @transform_1, window_bounds = array<i64: 128, 128>}, {transform_indices = @transform_2, window_bounds = array<i64: 1, 128>}, {transform_indices = @transform_3, window_bounds = array<i64: 1, 16, 128>}]} {
    %c0 = arith.constant 0 : index
    %c0_0 = arith.constant 0 : index
    %0 = vector.load %arg2[%c0, %c0_0] : memref<16x128xf32, #tpu.memory_space<vmem>>, vector<16x128xf32>
    %c0_1 = arith.constant 0 : index
    %c0_2 = arith.constant 0 : index
    %1 = vector.load %arg3[%c0_1, %c0_2] : memref<128x128xf32, #tpu.memory_space<vmem>>, vector<128x128xf32>
    %cst = arith.constant dense<0.000000e+00> : vector<16x128xf32>
    %2 = tpu.matmul %0, %1, %cst {dimension_numbers = #tpu.dot_dimension_numbers<[1], [0], [0], [1], [0, 0, 1, 1], [], []>} : vector<16x128xf32>, vector<128x128xf32>, vector<16x128xf32> -> vector<16x128xf32>
    %c0_3 = arith.constant 0 : index
    %c0_4 = arith.constant 0 : index
    %3 = vector.load %arg4[%c0_3, %c0_4] : memref<1x128xf32, #tpu.memory_space<vmem>>, vector<1x128xf32>
    %4 = vector.broadcast %3 : vector<1x128xf32> to vector<16x128xf32>
    %5 = arith.addf %2, %4 : vector<16x128xf32>
    %6 = vector.shape_cast %5 : vector<16x128xf32> to vector<1x16x128xf32>
    %c0_5 = arith.constant 0 : index
    %c0_6 = arith.constant 0 : index
    %c0_7 = arith.constant 0 : index
    %7 = vector.load %arg5[%c0_5, %c0_6, %c0_7] : memref<1x16x128xf32, #tpu.memory_space<vmem>>, vector<1x16x128xf32>
    tpu.vector_store %arg5[%c0_5, %c0_6, %c0_7], %6 {strides = array<i32>} : memref<1x16x128xf32, #tpu.memory_space<vmem>>, vector<1x16x128xf32>,
    return
  }
  func.func @transform_0(%arg0: i32, %arg1: i32) -> (i32, i32) {
    %c0_i32 = arith.constant 0 : i32
    %c0_i32_0 = arith.constant 0 : i32
    return %arg0, %c0_i32 : i32, i32
  }
  func.func @transform_1(%arg0: i32, %arg1: i32) -> (i32, i32) {
    %c0_i32 = arith.constant 0 : i32
    %c0_i32_0 = arith.constant 0 : i32
    return %c0_i32, %arg1 : i32, i32
  }
  func.func @transform_2(%arg0: i32, %arg1: i32) -> (i32, i32) {
    %c0_i32 = arith.constant 0 : i32
    %c0_i32_0 = arith.constant 0 : i32
    return %c0_i32, %arg1 : i32, i32
  }
  func.func @transform_3(%arg0: i32, %arg1: i32) -> (i32, i32, i32) {
    %c0_i32 = arith.constant 0 : i32
    %c0_i32_0 = arith.constant 0 : i32
    return %arg1, %arg0, %c0_i32 : i32, i32, i32
  }
}

module attributes {stable_mosaic.version = 11 : i64} {
  func.func @_attention_kernel(%arg0: i32, %arg1: i32, %arg2: memref<1x1x8x128xf32, #tpu.memory_space<vmem>>, %arg3: memref<1x1x8x128xf32, #tpu.memory_space<vmem>>, %arg4: memref<1x1x8x128xf32, #tpu.memory_space<vmem>>, %arg5: memref<1x1x8xf32, #tpu.memory_space<vmem>>, %arg6: memref<1x4x8x8xf32, #tpu.memory_space<vmem>>, %arg7: memref<1x8x128xf32, #tpu.memory_space<vmem>>) attributes {dimension_semantics = [#tpu.dimension_semantics<parallel>, #tpu.dimension_semantics<parallel>], iteration_bounds = array<i64: 2, 1>, scalar_prefetch = 0 : i64, scratch_operands = 0 : i64, tpu.core_type = #tpu.core_type<tc>, window_params = [{transform_indices = @transform_0, window_bounds = array<i64: 1, 1, 8, 128>}, {transform_indices = @transform_1, window_bounds = array<i64: 1, 1, 8, 128>}, {transform_indices = @transform_2, window_bounds = array<i64: 1, 1, 8, 128>}, {transform_indices = @transform_3, window_bounds = array<i64: 1, 1, 8>}, {transform_indices = @transform_4, window_bounds = array<i64: 1, 4, 8, 8>}, {transform_indices = @transform_5, window_bounds = array<i64: 1, 8, 128>}]} {
    %c0 = arith.constant 0 : index
    %c0_0 = arith.constant 0 : index
    %c0_1 = arith.constant 0 : index
    %0 = vector.load %arg5[%c0, %c0_0, %c0_1] : memref<1x1x8xf32, #tpu.memory_space<vmem>>, vector<1x1x8xf32>
    %1 = vector.shape_cast %0 : vector<1x1x8xf32> to vector<1x8xf32>
    %c0_2 = arith.constant 0 : index
    %c0_3 = arith.constant 0 : index
    %c0_4 = arith.constant 0 : index
    %c0_5 = arith.constant 0 : index
    %2 = vector.load %arg2[%c0_2, %c0_3, %c0_4, %c0_5] : memref<1x1x8x128xf32, #tpu.memory_space<vmem>>, vector<1x1x8x32xf32>
    %3 = vector.shape_cast %2 : vector<1x1x8x32xf32> to vector<8x32xf32>
    %c0_6 = arith.constant 0 : index
    %c0_7 = arith.constant 0 : index
    %c0_8 = arith.constant 0 : index
    %c0_9 = arith.constant 0 : index
    %4 = vector.load %arg3[%c0_6, %c0_7, %c0_8, %c0_9] : memref<1x1x8x128xf32, #tpu.memory_space<vmem>>, vector<1x1x8x32xf32>
    %5 = vector.shape_cast %4 : vector<1x1x8x32xf32> to vector<8x32xf32>
    %cst = arith.constant dense<0.000000e+00> : vector<8x8xf32>
    %6 = tpu.matmul %3, %5, %cst {dimension_numbers = #tpu.dot_dimension_numbers<[1], [1], [0], [0], [0, 0, 1, 0], [], []>} : vector<8x32xf32>, vector<8x32xf32>, vector<8x8xf32> -> vector<8x8xf32>
    %cst_10 = arith.constant 0.176776692 : f32
    %7 = vector.broadcast %cst_10 : f32 to vector<8x8xf32>
    %8 = arith.mulf %6, %7 : vector<8x8xf32>
    %9 = vector.broadcast %1 : vector<1x8xf32> to vector<8x8xf32>
    %10 = arith.addf %8, %9 : vector<8x8xf32>
    %cst_11 = arith.constant dense<0xFF800000> : vector<8xf32>
    %11 = vector.multi_reduction <maximumf>, %10, %cst_11 [1] : vector<8x8xf32> to vector<8xf32>
    %12 = vector.shape_cast %11 : vector<8xf32> to vector<8x1xf32>
    %13 = vector.broadcast %12 : vector<8x1xf32> to vector<8x8xf32>
    %14 = arith.subf %10, %13 : vector<8x8xf32>
    %15 = math.exp %14 : vector<8x8xf32>
    %cst_12 = arith.constant dense<0.000000e+00> : vector<8xf32>
    %16 = vector.multi_reduction <add>, %15, %cst_12 [1] : vector<8x8xf32> to vector<8xf32>
    %17 = vector.shape_cast %16 : vector<8xf32> to vector<8x1xf32>
    %18 = tpu.reciprocal %17 : vector<8x1xf32> -> vector<8x1xf32>
    %19 = vector.broadcast %18 : vector<8x1xf32> to vector<8x8xf32>
    %20 = arith.mulf %15, %19 : vector<8x8xf32>
    %c0_13 = arith.constant 0 : index
    %c0_14 = arith.constant 0 : index
    %c0_15 = arith.constant 0 : index
    %c0_16 = arith.constant 0 : index
    %21 = vector.load %arg6[%c0_13, %c0_14, %c0_15, %c0_16] : memref<1x4x8x8xf32, #tpu.memory_space<vmem>>, vector<1x1x8x8xf32>
    %22 = vector.shape_cast %21 : vector<1x1x8x8xf32> to vector<8x8xf32>
    %23 = vector.shape_cast %20 : vector<8x8xf32> to vector<1x1x8x8xf32>
    tpu.vector_store %arg6[%c0_13, %c0_14, %c0_15, %c0_16], %23 {strides = array<i32>} : memref<1x4x8x8xf32, #tpu.memory_space<vmem>>, vector<1x1x8x8xf32>,
    %c0_17 = arith.constant 0 : index
    %c0_18 = arith.constant 0 : index
    %c0_19 = arith.constant 0 : index
    %c0_20 = arith.constant 0 : index
    %24 = vector.load %arg4[%c0_17, %c0_18, %c0_19, %c0_20] : memref<1x1x8x128xf32, #tpu.memory_space<vmem>>, vector<1x1x8x32xf32>
    %25 = vector.shape_cast %24 : vector<1x1x8x32xf32> to vector<8x32xf32>
    %cst_21 = arith.constant dense<0.000000e+00> : vector<8x32xf32>
    %26 = tpu.matmul %20, %25, %cst_21 {dimension_numbers = #tpu.dot_dimension_numbers<[1], [0], [0], [1], [0, 0, 1, 1], [], []>} : vector<8x8xf32>, vector<8x32xf32>, vector<8x32xf32> -> vector<8x32xf32>
    %c0_22 = arith.constant 0 : index
    %c0_23 = arith.constant 0 : index
    %c0_24 = arith.constant 0 : index
    %27 = vector.load %arg7[%c0_22, %c0_23, %c0_24] : memref<1x8x128xf32, #tpu.memory_space<vmem>>, vector<1x8x32xf32>
    %28 = vector.shape_cast %27 : vector<1x8x32xf32> to vector<8x32xf32>
    %29 = vector.shape_cast %26 : vector<8x32xf32> to vector<1x8x32xf32>
    tpu.vector_store %arg7[%c0_22, %c0_23, %c0_24], %29 {strides = array<i32>} : memref<1x8x128xf32, #tpu.memory_space<vmem>>, vector<1x8x32xf32>,
    %c0_25 = arith.constant 0 : index
    %c0_26 = arith.constant 0 : index
    %c0_27 = arith.constant 0 : index
    %c32 = arith.constant 32 : index
    %30 = vector.load %arg2[%c0_25, %c0_26, %c0_27, %c32] : memref<1x1x8x128xf32, #tpu.memory_space<vmem>>, vector<1x1x8x32xf32>
    %31 = vector.shape_cast %30 : vector<1x1x8x32xf32> to vector<8x32xf32>
    %c0_28 = arith.constant 0 : index
    %c0_29 = arith.constant 0 : index
    %c0_30 = arith.constant 0 : index
    %c32_31 = arith.constant 32 : index
    %32 = vector.load %arg3[%c0_28, %c0_29, %c0_30, %c32_31] : memref<1x1x8x128xf32, #tpu.memory_space<vmem>>, vector<1x1x8x32xf32>
    %33 = vector.shape_cast %32 : vector<1x1x8x32xf32> to vector<8x32xf32>
    %cst_32 = arith.constant dense<0.000000e+00> : vector<8x8xf32>
    %34 = tpu.matmul %31, %33, %cst_32 {dimension_numbers = #tpu.dot_dimension_numbers<[1], [1], [0], [0], [0, 0, 1, 0], [], []>} : vector<8x32xf32>, vector<8x32xf32>, vector<8x8xf32> -> vector<8x8xf32>
    %cst_33 = arith.constant 0.176776692 : f32
    %35 = vector.broadcast %cst_33 : f32 to vector<8x8xf32>
    %36 = arith.mulf %34, %35 : vector<8x8xf32>
    %37 = vector.broadcast %1 : vector<1x8xf32> to vector<8x8xf32>
    %38 = arith.addf %36, %37 : vector<8x8xf32>
    %cst_34 = arith.constant dense<0xFF800000> : vector<8xf32>
    %39 = vector.multi_reduction <maximumf>, %38, %cst_34 [1] : vector<8x8xf32> to vector<8xf32>
    %40 = vector.shape_cast %39 : vector<8xf32> to vector<8x1xf32>
    %41 = vector.broadcast %40 : vector<8x1xf32> to vector<8x8xf32>
    %42 = arith.subf %38, %41 : vector<8x8xf32>
    %43 = math.exp %42 : vector<8x8xf32>
    %cst_35 = arith.constant dense<0.000000e+00> : vector<8xf32>
    %44 = vector.multi_reduction <add>, %43, %cst_35 [1] : vector<8x8xf32> to vector<8xf32>
    %45 = vector.shape_cast %44 : vector<8xf32> to vector<8x1xf32>
    %46 = tpu.reciprocal %45 : vector<8x1xf32> -> vector<8x1xf32>
    %47 = vector.broadcast %46 : vector<8x1xf32> to vector<8x8xf32>
    %48 = arith.mulf %43, %47 : vector<8x8xf32>
    %c0_36 = arith.constant 0 : index
    %c1 = arith.constant 1 : index
    %c0_37 = arith.constant 0 : index
    %c0_38 = arith.constant 0 : index
    %49 = vector.load %arg6[%c0_36, %c1, %c0_37, %c0_38] : memref<1x4x8x8xf32, #tpu.memory_space<vmem>>, vector<1x1x8x8xf32>
    %50 = vector.shape_cast %49 : vector<1x1x8x8xf32> to vector<8x8xf32>
    %51 = vector.shape_cast %48 : vector<8x8xf32> to vector<1x1x8x8xf32>
    tpu.vector_store %arg6[%c0_36, %c1, %c0_37, %c0_38], %51 {strides = array<i32>} : memref<1x4x8x8xf32, #tpu.memory_space<vmem>>, vector<1x1x8x8xf32>,
    %c0_39 = arith.constant 0 : index
    %c0_40 = arith.constant 0 : index
    %c0_41 = arith.constant 0 : index
    %c32_42 = arith.constant 32 : index
    %52 = vector.load %arg4[%c0_39, %c0_40, %c0_41, %c32_42] : memref<1x1x8x128xf32, #tpu.memory_space<vmem>>, vector<1x1x8x32xf32>
    %53 = vector.shape_cast %52 : vector<1x1x8x32xf32> to vector<8x32xf32>
    %cst_43 = arith.constant dense<0.000000e+00> : vector<8x32xf32>
    %54 = tpu.matmul %48, %53, %cst_43 {dimension_numbers = #tpu.dot_dimension_numbers<[1], [0], [0], [1], [0, 0, 1, 1], [], []>} : vector<8x8xf32>, vector<8x32xf32>, vector<8x32xf32> -> vector<8x32xf32>
    %c0_44 = arith.constant 0 : index
    %c0_45 = arith.constant 0 : index
    %c32_46 = arith.constant 32 : index
    %55 = vector.load %arg7[%c0_44, %c0_45, %c32_46] : memref<1x8x128xf32, #tpu.memory_space<vmem>>, vector<1x8x32xf32>
    %56 = vector.shape_cast %55 : vector<1x8x32xf32> to vector<8x32xf32>
    %57 = vector.shape_cast %54 : vector<8x32xf32> to vector<1x8x32xf32>
    tpu.vector_store %arg7[%c0_44, %c0_45, %c32_46], %57 {strides = array<i32>} : memref<1x8x128xf32, #tpu.memory_space<vmem>>, vector<1x8x32xf32>,
    %c0_47 = arith.constant 0 : index
    %c0_48 = arith.constant 0 : index
    %c0_49 = arith.constant 0 : index
    %c64 = arith.constant 64 : index
    %58 = vector.load %arg2[%c0_47, %c0_48, %c0_49, %c64] : memref<1x1x8x128xf32, #tpu.memory_space<vmem>>, vector<1x1x8x32xf32>
    %59 = vector.shape_cast %58 : vector<1x1x8x32xf32> to vector<8x32xf32>
    %c0_50 = arith.constant 0 : index
    %c0_51 = arith.constant 0 : index
    %c0_52 = arith.constant 0 : index
    %c64_53 = arith.constant 64 : index
    %60 = vector.load %arg3[%c0_50, %c0_51, %c0_52, %c64_53] : memref<1x1x8x128xf32, #tpu.memory_space<vmem>>, vector<1x1x8x32xf32>
    %61 = vector.shape_cast %60 : vector<1x1x8x32xf32> to vector<8x32xf32>
    %cst_54 = arith.constant dense<0.000000e+00> : vector<8x8xf32>
    %62 = tpu.matmul %59, %61, %cst_54 {dimension_numbers = #tpu.dot_dimension_numbers<[1], [1], [0], [0], [0, 0, 1, 0], [], []>} : vector<8x32xf32>, vector<8x32xf32>, vector<8x8xf32> -> vector<8x8xf32>
    %cst_55 = arith.constant 0.176776692 : f32
    %63 = vector.broadcast %cst_55 : f32 to vector<8x8xf32>
    %64 = arith.mulf %62, %63 : vector<8x8xf32>
    %65 = vector.broadcast %1 : vector<1x8xf32> to vector<8x8xf32>
    %66 = arith.addf %64, %65 : vector<8x8xf32>
    %cst_56 = arith.constant dense<0xFF800000> : vector<8xf32>
    %67 = vector.multi_reduction <maximumf>, %66, %cst_56 [1] : vector<8x8xf32> to vector<8xf32>
    %68 = vector.shape_cast %67 : vector<8xf32> to vector<8x1xf32>
    %69 = vector.broadcast %68 : vector<8x1xf32> to vector<8x8xf32>
    %70 = arith.subf %66, %69 : vector<8x8xf32>
    %71 = math.exp %70 : vector<8x8xf32>
    %cst_57 = arith.constant dense<0.000000e+00> : vector<8xf32>
    %72 = vector.multi_reduction <add>, %71, %cst_57 [1] : vector<8x8xf32> to vector<8xf32>
    %73 = vector.shape_cast %72 : vector<8xf32> to vector<8x1xf32>
    %74 = tpu.reciprocal %73 : vector<8x1xf32> -> vector<8x1xf32>
    %75 = vector.broadcast %74 : vector<8x1xf32> to vector<8x8xf32>
    %76 = arith.mulf %71, %75 : vector<8x8xf32>
    %c0_58 = arith.constant 0 : index
    %c2 = arith.constant 2 : index
    %c0_59 = arith.constant 0 : index
    %c0_60 = arith.constant 0 : index
    %77 = vector.load %arg6[%c0_58, %c2, %c0_59, %c0_60] : memref<1x4x8x8xf32, #tpu.memory_space<vmem>>, vector<1x1x8x8xf32>
    %78 = vector.shape_cast %77 : vector<1x1x8x8xf32> to vector<8x8xf32>
    %79 = vector.shape_cast %76 : vector<8x8xf32> to vector<1x1x8x8xf32>
    tpu.vector_store %arg6[%c0_58, %c2, %c0_59, %c0_60], %79 {strides = array<i32>} : memref<1x4x8x8xf32, #tpu.memory_space<vmem>>, vector<1x1x8x8xf32>,
    %c0_61 = arith.constant 0 : index
    %c0_62 = arith.constant 0 : index
    %c0_63 = arith.constant 0 : index
    %c64_64 = arith.constant 64 : index
    %80 = vector.load %arg4[%c0_61, %c0_62, %c0_63, %c64_64] : memref<1x1x8x128xf32, #tpu.memory_space<vmem>>, vector<1x1x8x32xf32>
    %81 = vector.shape_cast %80 : vector<1x1x8x32xf32> to vector<8x32xf32>
    %cst_65 = arith.constant dense<0.000000e+00> : vector<8x32xf32>
    %82 = tpu.matmul %76, %81, %cst_65 {dimension_numbers = #tpu.dot_dimension_numbers<[1], [0], [0], [1], [0, 0, 1, 1], [], []>} : vector<8x8xf32>, vector<8x32xf32>, vector<8x32xf32> -> vector<8x32xf32>
    %c0_66 = arith.constant 0 : index
    %c0_67 = arith.constant 0 : index
    %c64_68 = arith.constant 64 : index
    %83 = vector.load %arg7[%c0_66, %c0_67, %c64_68] : memref<1x8x128xf32, #tpu.memory_space<vmem>>, vector<1x8x32xf32>
    %84 = vector.shape_cast %83 : vector<1x8x32xf32> to vector<8x32xf32>
    %85 = vector.shape_cast %82 : vector<8x32xf32> to vector<1x8x32xf32>
    tpu.vector_store %arg7[%c0_66, %c0_67, %c64_68], %85 {strides = array<i32>} : memref<1x8x128xf32, #tpu.memory_space<vmem>>, vector<1x8x32xf32>,
    %c0_69 = arith.constant 0 : index
    %c0_70 = arith.constant 0 : index
    %c0_71 = arith.constant 0 : index
    %c96 = arith.constant 96 : index
    %86 = vector.load %arg2[%c0_69, %c0_70, %c0_71, %c96] : memref<1x1x8x128xf32, #tpu.memory_space<vmem>>, vector<1x1x8x32xf32>
    %87 = vector.shape_cast %86 : vector<1x1x8x32xf32> to vector<8x32xf32>
    %c0_72 = arith.constant 0 : index
    %c0_73 = arith.constant 0 : index
    %c0_74 = arith.constant 0 : index
    %c96_75 = arith.constant 96 : index
    %88 = vector.load %arg3[%c0_72, %c0_73, %c0_74, %c96_75] : memref<1x1x8x128xf32, #tpu.memory_space<vmem>>, vector<1x1x8x32xf32>
    %89 = vector.shape_cast %88 : vector<1x1x8x32xf32> to vector<8x32xf32>
    %cst_76 = arith.constant dense<0.000000e+00> : vector<8x8xf32>
    %90 = tpu.matmul %87, %89, %cst_76 {dimension_numbers = #tpu.dot_dimension_numbers<[1], [1], [0], [0], [0, 0, 1, 0], [], []>} : vector<8x32xf32>, vector<8x32xf32>, vector<8x8xf32> -> vector<8x8xf32>
    %cst_77 = arith.constant 0.176776692 : f32
    %91 = vector.broadcast %cst_77 : f32 to vector<8x8xf32>
    %92 = arith.mulf %90, %91 : vector<8x8xf32>
    %93 = vector.broadcast %1 : vector<1x8xf32> to vector<8x8xf32>
    %94 = arith.addf %92, %93 : vector<8x8xf32>
    %cst_78 = arith.constant dense<0xFF800000> : vector<8xf32>
    %95 = vector.multi_reduction <maximumf>, %94, %cst_78 [1] : vector<8x8xf32> to vector<8xf32>
    %96 = vector.shape_cast %95 : vector<8xf32> to vector<8x1xf32>
    %97 = vector.broadcast %96 : vector<8x1xf32> to vector<8x8xf32>
    %98 = arith.subf %94, %97 : vector<8x8xf32>
    %99 = math.exp %98 : vector<8x8xf32>
    %cst_79 = arith.constant dense<0.000000e+00> : vector<8xf32>
    %100 = vector.multi_reduction <add>, %99, %cst_79 [1] : vector<8x8xf32> to vector<8xf32>
    %101 = vector.shape_cast %100 : vector<8xf32> to vector<8x1xf32>
    %102 = tpu.reciprocal %101 : vector<8x1xf32> -> vector<8x1xf32>
    %103 = vector.broadcast %102 : vector<8x1xf32> to vector<8x8xf32>
    %104 = arith.mulf %99, %103 : vector<8x8xf32>
    %c0_80 = arith.constant 0 : index
    %c3 = arith.constant 3 : index
    %c0_81 = arith.constant 0 : index
    %c0_82 = arith.constant 0 : index
    %105 = vector.load %arg6[%c0_80, %c3, %c0_81, %c0_82] : memref<1x4x8x8xf32, #tpu.memory_space<vmem>>, vector<1x1x8x8xf32>
    %106 = vector.shape_cast %105 : vector<1x1x8x8xf32> to vector<8x8xf32>
    %107 = vector.shape_cast %104 : vector<8x8xf32> to vector<1x1x8x8xf32>
    tpu.vector_store %arg6[%c0_80, %c3, %c0_81, %c0_82], %107 {strides = array<i32>} : memref<1x4x8x8xf32, #tpu.memory_space<vmem>>, vector<1x1x8x8xf32>,
    %c0_83 = arith.constant 0 : index
    %c0_84 = arith.constant 0 : index
    %c0_85 = arith.constant 0 : index
    %c96_86 = arith.constant 96 : index
    %108 = vector.load %arg4[%c0_83, %c0_84, %c0_85, %c96_86] : memref<1x1x8x128xf32, #tpu.memory_space<vmem>>, vector<1x1x8x32xf32>
    %109 = vector.shape_cast %108 : vector<1x1x8x32xf32> to vector<8x32xf32>
    %cst_87 = arith.constant dense<0.000000e+00> : vector<8x32xf32>
    %110 = tpu.matmul %104, %109, %cst_87 {dimension_numbers = #tpu.dot_dimension_numbers<[1], [0], [0], [1], [0, 0, 1, 1], [], []>} : vector<8x8xf32>, vector<8x32xf32>, vector<8x32xf32> -> vector<8x32xf32>
    %c0_88 = arith.constant 0 : index
    %c0_89 = arith.constant 0 : index
    %c96_90 = arith.constant 96 : index
    %111 = vector.load %arg7[%c0_88, %c0_89, %c96_90] : memref<1x8x128xf32, #tpu.memory_space<vmem>>, vector<1x8x32xf32>
    %112 = vector.shape_cast %111 : vector<1x8x32xf32> to vector<8x32xf32>
    %113 = vector.shape_cast %110 : vector<8x32xf32> to vector<1x8x32xf32>
    tpu.vector_store %arg7[%c0_88, %c0_89, %c96_90], %113 {strides = array<i32>} : memref<1x8x128xf32, #tpu.memory_space<vmem>>, vector<1x8x32xf32>,
    return
  }
  func.func @transform_0(%arg0: i32, %arg1: i32) -> (i32, i32, i32, i32) {
    %c0_i32 = arith.constant 0 : i32
    %c0_i32_0 = arith.constant 0 : i32
    %c0_i32_1 = arith.constant 0 : i32
    return %c0_i32, %arg0, %arg1, %c0_i32_0 : i32, i32, i32, i32
  }
  func.func @transform_1(%arg0: i32, %arg1: i32) -> (i32, i32, i32, i32) {
    %c1_i32 = arith.constant 1 : i32
    %c0_i32 = arith.constant 0 : i32
    %c0_i32_0 = arith.constant 0 : i32
    %c0_i32_1 = arith.constant 0 : i32
    return %c1_i32, %arg0, %c0_i32, %c0_i32_0 : i32, i32, i32, i32
  }
  func.func @transform_2(%arg0: i32, %arg1: i32) -> (i32, i32, i32, i32) {
    %c2_i32 = arith.constant 2 : i32
    %c0_i32 = arith.constant 0 : i32
    %c0_i32_0 = arith.constant 0 : i32
    %c0_i32_1 = arith.constant 0 : i32
    return %c2_i32, %arg0, %c0_i32, %c0_i32_0 : i32, i32, i32, i32
  }
  func.func @transform_3(%arg0: i32, %arg1: i32) -> (i32, i32, i32) {
    %c0_i32 = arith.constant 0 : i32
    %c0_i32_0 = arith.constant 0 : i32
    %c0_i32_1 = arith.constant 0 : i32
    return %arg0, %c0_i32, %c0_i32_0 : i32, i32, i32
  }
  func.func @transform_4(%arg0: i32, %arg1: i32) -> (i32, i32, i32, i32) {
    %c0_i32 = arith.constant 0 : i32
    %c0_i32_0 = arith.constant 0 : i32
    %c0_i32_1 = arith.constant 0 : i32
    return %arg0, %c0_i32, %arg1, %c0_i32_0 : i32, i32, i32, i32
  }
  func.func @transform_5(%arg0: i32, %arg1: i32) -> (i32, i32, i32) {
    %c0_i32 = arith.constant 0 : i32
    %c0_i32_0 = arith.constant 0 : i32
    return %arg0, %arg1, %c0_i32 : i32, i32, i32
  }
}

module attributes {stable_mosaic.version = 11 : i64} {
  func.func @_linear_res_ln_kernel_1k(%arg0: i32, %arg1: memref<16x128xf32, #tpu.memory_space<vmem>>, %arg2: memref<128x128xf32, #tpu.memory_space<vmem>>, %arg3: memref<1x128xf32, #tpu.memory_space<vmem>>, %arg4: memref<16x128xf32, #tpu.memory_space<vmem>>, %arg5: memref<1x128xf32, #tpu.memory_space<vmem>>, %arg6: memref<1x128xf32, #tpu.memory_space<vmem>>, %arg7: memref<16x128xf32, #tpu.memory_space<vmem>>) attributes {dimension_semantics = [#tpu.dimension_semantics<parallel>], iteration_bounds = array<i64: 1>, scalar_prefetch = 0 : i64, scratch_operands = 0 : i64, tpu.core_type = #tpu.core_type<tc>, window_params = [{transform_indices = @transform_0, window_bounds = array<i64: 16, 128>}, {pipeline_mode = #tpu.pipeline_mode<synchronous>, transform_indices = @transform_1, window_bounds = array<i64: 128, 128>}, {pipeline_mode = #tpu.pipeline_mode<synchronous>, transform_indices = @transform_2, window_bounds = array<i64: 1, 128>}, {transform_indices = @transform_3, window_bounds = array<i64: 16, 128>}, {pipeline_mode = #tpu.pipeline_mode<synchronous>, transform_indices = @transform_4, window_bounds = array<i64: 1, 128>}, {pipeline_mode = #tpu.pipeline_mode<synchronous>, transform_indices = @transform_5, window_bounds = array<i64: 1, 128>}, {transform_indices = @transform_6, window_bounds = array<i64: 16, 128>}]} {
    %c0 = arith.constant 0 : index
    %c0_0 = arith.constant 0 : index
    %0 = vector.load %arg1[%c0, %c0_0] : memref<16x128xf32, #tpu.memory_space<vmem>>, vector<16x128xf32>
    %c0_1 = arith.constant 0 : index
    %c0_2 = arith.constant 0 : index
    %1 = vector.load %arg2[%c0_1, %c0_2] : memref<128x128xf32, #tpu.memory_space<vmem>>, vector<128x128xf32>
    %cst = arith.constant dense<0.000000e+00> : vector<16x128xf32>
    %2 = tpu.matmul %0, %1, %cst {dimension_numbers = #tpu.dot_dimension_numbers<[1], [0], [0], [1], [0, 0, 1, 1], [], []>} : vector<16x128xf32>, vector<128x128xf32>, vector<16x128xf32> -> vector<16x128xf32>
    %c0_3 = arith.constant 0 : index
    %c0_4 = arith.constant 0 : index
    %3 = vector.load %arg3[%c0_3, %c0_4] : memref<1x128xf32, #tpu.memory_space<vmem>>, vector<1x128xf32>
    %4 = vector.broadcast %3 : vector<1x128xf32> to vector<16x128xf32>
    %5 = arith.addf %2, %4 : vector<16x128xf32>
    %c0_5 = arith.constant 0 : index
    %c0_6 = arith.constant 0 : index
    %6 = vector.load %arg4[%c0_5, %c0_6] : memref<16x128xf32, #tpu.memory_space<vmem>>, vector<16x128xf32>
    %7 = arith.addf %5, %6 : vector<16x128xf32>
    %cst_7 = arith.constant dense<0.000000e+00> : vector<16xf32>
    %8 = vector.multi_reduction <add>, %7, %cst_7 [1] : vector<16x128xf32> to vector<16xf32>
    %9 = vector.shape_cast %8 : vector<16xf32> to vector<16x1xf32>
    %cst_8 = arith.constant 1.280000e+02 : f32
    %10 = vector.broadcast %cst_8 : f32 to vector<16x1xf32>
    %11 = arith.divf %9, %10 : vector<16x1xf32>
    %12 = vector.broadcast %11 : vector<16x1xf32> to vector<16x128xf32>
    %13 = arith.subf %7, %12 : vector<16x128xf32>
    %14 = arith.mulf %13, %13 : vector<16x128xf32>
    %cst_9 = arith.constant dense<0.000000e+00> : vector<16xf32>
    %15 = vector.multi_reduction <add>, %14, %cst_9 [1] : vector<16x128xf32> to vector<16xf32>
    %16 = vector.shape_cast %15 : vector<16xf32> to vector<16x1xf32>
    %cst_10 = arith.constant 1.280000e+02 : f32
    %17 = vector.broadcast %cst_10 : f32 to vector<16x1xf32>
    %18 = arith.divf %16, %17 : vector<16x1xf32>
    %c0_11 = arith.constant 0 : index
    %c0_12 = arith.constant 0 : index
    %19 = vector.load %arg5[%c0_11, %c0_12] : memref<1x128xf32, #tpu.memory_space<vmem>>, vector<1x128xf32>
    %c0_13 = arith.constant 0 : index
    %c0_14 = arith.constant 0 : index
    %20 = vector.load %arg6[%c0_13, %c0_14] : memref<1x128xf32, #tpu.memory_space<vmem>>, vector<1x128xf32>
    %cst_15 = arith.constant 9.99999996E-13 : f32
    %21 = vector.broadcast %cst_15 : f32 to vector<16x1xf32>
    %22 = arith.addf %18, %21 : vector<16x1xf32>
    %23 = math.rsqrt %22 : vector<16x1xf32>
    %24 = vector.broadcast %23 : vector<16x1xf32> to vector<16x128xf32>
    %25 = arith.mulf %13, %24 : vector<16x128xf32>
    %26 = vector.broadcast %19 : vector<1x128xf32> to vector<16x128xf32>
    %27 = arith.mulf %25, %26 : vector<16x128xf32>
    %28 = vector.broadcast %20 : vector<1x128xf32> to vector<16x128xf32>
    %29 = arith.addf %27, %28 : vector<16x128xf32>
    %c0_16 = arith.constant 0 : index
    %c0_17 = arith.constant 0 : index
    %30 = vector.load %arg7[%c0_16, %c0_17] : memref<16x128xf32, #tpu.memory_space<vmem>>, vector<16x128xf32>
    tpu.vector_store %arg7[%c0_16, %c0_17], %29 {strides = array<i32>} : memref<16x128xf32, #tpu.memory_space<vmem>>, vector<16x128xf32>,
    return
  }
  func.func @transform_0(%arg0: i32) -> (i32, i32) {
    %c0_i32 = arith.constant 0 : i32
    %c0_i32_0 = arith.constant 0 : i32
    return %arg0, %c0_i32 : i32, i32
  }
  func.func @transform_1(%arg0: i32) -> (i32, i32) {
    %c0_i32 = arith.constant 0 : i32
    %c0_i32_0 = arith.constant 0 : i32
    %c0_i32_1 = arith.constant 0 : i32
    return %c0_i32, %c0_i32_0 : i32, i32
  }
  func.func @transform_2(%arg0: i32) -> (i32, i32) {
    %c0_i32 = arith.constant 0 : i32
    %c0_i32_0 = arith.constant 0 : i32
    %c0_i32_1 = arith.constant 0 : i32
    return %c0_i32, %c0_i32_0 : i32, i32
  }
  func.func @transform_3(%arg0: i32) -> (i32, i32) {
    %c0_i32 = arith.constant 0 : i32
    %c0_i32_0 = arith.constant 0 : i32
    return %arg0, %c0_i32 : i32, i32
  }
  func.func @transform_4(%arg0: i32) -> (i32, i32) {
    %c0_i32 = arith.constant 0 : i32
    %c0_i32_0 = arith.constant 0 : i32
    %c0_i32_1 = arith.constant 0 : i32
    return %c0_i32, %c0_i32_0 : i32, i32
  }
  func.func @transform_5(%arg0: i32) -> (i32, i32) {
    %c0_i32 = arith.constant 0 : i32
    %c0_i32_0 = arith.constant 0 : i32
    %c0_i32_1 = arith.constant 0 : i32
    return %c0_i32, %c0_i32_0 : i32, i32
  }
  func.func @transform_6(%arg0: i32) -> (i32, i32) {
    %c0_i32 = arith.constant 0 : i32
    %c0_i32_0 = arith.constant 0 : i32
    return %arg0, %c0_i32 : i32, i32
  }
}

module attributes {stable_mosaic.version = 11 : i64} {
  func.func @_linear_kernel_1k(%arg0: i32, %arg1: i32, %arg2: memref<16x128xf32, #tpu.memory_space<vmem>>, %arg3: memref<128x512xf32, #tpu.memory_space<vmem>>, %arg4: memref<1x512xf32, #tpu.memory_space<vmem>>, %arg5: memref<16x512xf32, #tpu.memory_space<vmem>>) attributes {dimension_semantics = [#tpu.dimension_semantics<parallel>, #tpu.dimension_semantics<parallel>], iteration_bounds = array<i64: 1, 1>, scalar_prefetch = 0 : i64, scratch_operands = 0 : i64, tpu.core_type = #tpu.core_type<tc>, window_params = [{transform_indices = @transform_0, window_bounds = array<i64: 16, 128>}, {transform_indices = @transform_1, window_bounds = array<i64: 128, 512>}, {transform_indices = @transform_2, window_bounds = array<i64: 1, 512>}, {transform_indices = @transform_3, window_bounds = array<i64: 16, 512>}]} {
    %c0 = arith.constant 0 : index
    %c0_0 = arith.constant 0 : index
    %0 = vector.load %arg2[%c0, %c0_0] : memref<16x128xf32, #tpu.memory_space<vmem>>, vector<16x128xf32>
    %c0_1 = arith.constant 0 : index
    %c0_2 = arith.constant 0 : index
    %1 = vector.load %arg3[%c0_1, %c0_2] : memref<128x512xf32, #tpu.memory_space<vmem>>, vector<128x512xf32>
    %cst = arith.constant dense<0.000000e+00> : vector<16x512xf32>
    %2 = tpu.matmul %0, %1, %cst {dimension_numbers = #tpu.dot_dimension_numbers<[1], [0], [0], [1], [0, 0, 1, 1], [], []>} : vector<16x128xf32>, vector<128x512xf32>, vector<16x512xf32> -> vector<16x512xf32>
    %c0_3 = arith.constant 0 : index
    %c0_4 = arith.constant 0 : index
    %3 = vector.load %arg4[%c0_3, %c0_4] : memref<1x512xf32, #tpu.memory_space<vmem>>, vector<1x512xf32>
    %4 = vector.broadcast %3 : vector<1x512xf32> to vector<16x512xf32>
    %5 = arith.addf %2, %4 : vector<16x512xf32>
    %cst_5 = arith.constant 5.000000e-01 : f32
    %6 = vector.broadcast %cst_5 : f32 to vector<16x512xf32>
    %7 = arith.mulf %5, %6 : vector<16x512xf32>
    %cst_6 = arith.constant 0.707106769 : f32
    %8 = vector.broadcast %cst_6 : f32 to vector<16x512xf32>
    %9 = arith.mulf %5, %8 : vector<16x512xf32>
    %10 = math.erf %9 : vector<16x512xf32>
    %cst_7 = arith.constant 1.000000e+00 : f32
    %11 = vector.broadcast %cst_7 : f32 to vector<16x512xf32>
    %12 = arith.addf %11, %10 : vector<16x512xf32>
    %13 = arith.mulf %7, %12 : vector<16x512xf32>
    %c0_8 = arith.constant 0 : index
    %c0_9 = arith.constant 0 : index
    %14 = vector.load %arg5[%c0_8, %c0_9] : memref<16x512xf32, #tpu.memory_space<vmem>>, vector<16x512xf32>
    tpu.vector_store %arg5[%c0_8, %c0_9], %13 {strides = array<i32>} : memref<16x512xf32, #tpu.memory_space<vmem>>, vector<16x512xf32>,
    return
  }
  func.func @transform_0(%arg0: i32, %arg1: i32) -> (i32, i32) {
    %c0_i32 = arith.constant 0 : i32
    %c0_i32_0 = arith.constant 0 : i32
    return %arg0, %c0_i32 : i32, i32
  }
  func.func @transform_1(%arg0: i32, %arg1: i32) -> (i32, i32) {
    %c0_i32 = arith.constant 0 : i32
    %c0_i32_0 = arith.constant 0 : i32
    return %c0_i32, %arg1 : i32, i32
  }
  func.func @transform_2(%arg0: i32, %arg1: i32) -> (i32, i32) {
    %c0_i32 = arith.constant 0 : i32
    %c0_i32_0 = arith.constant 0 : i32
    return %c0_i32, %arg1 : i32, i32
  }
  func.func @transform_3(%arg0: i32, %arg1: i32) -> (i32, i32) {
    %c0_i32 = arith.constant 0 : i32
    return %arg0, %arg1 : i32, i32
  }
}

module attributes {stable_mosaic.version = 11 : i64} {
  func.func @_linear_res_ln_kernel_1k(%arg0: i32, %arg1: memref<16x512xf32, #tpu.memory_space<vmem>>, %arg2: memref<512x128xf32, #tpu.memory_space<vmem>>, %arg3: memref<1x128xf32, #tpu.memory_space<vmem>>, %arg4: memref<16x128xf32, #tpu.memory_space<vmem>>, %arg5: memref<1x128xf32, #tpu.memory_space<vmem>>, %arg6: memref<1x128xf32, #tpu.memory_space<vmem>>, %arg7: memref<16x128xf32, #tpu.memory_space<vmem>>) attributes {dimension_semantics = [#tpu.dimension_semantics<parallel>], iteration_bounds = array<i64: 1>, scalar_prefetch = 0 : i64, scratch_operands = 0 : i64, tpu.core_type = #tpu.core_type<tc>, window_params = [{transform_indices = @transform_0, window_bounds = array<i64: 16, 512>}, {pipeline_mode = #tpu.pipeline_mode<synchronous>, transform_indices = @transform_1, window_bounds = array<i64: 512, 128>}, {pipeline_mode = #tpu.pipeline_mode<synchronous>, transform_indices = @transform_2, window_bounds = array<i64: 1, 128>}, {transform_indices = @transform_3, window_bounds = array<i64: 16, 128>}, {pipeline_mode = #tpu.pipeline_mode<synchronous>, transform_indices = @transform_4, window_bounds = array<i64: 1, 128>}, {pipeline_mode = #tpu.pipeline_mode<synchronous>, transform_indices = @transform_5, window_bounds = array<i64: 1, 128>}, {transform_indices = @transform_6, window_bounds = array<i64: 16, 128>}]} {
    %c0 = arith.constant 0 : index
    %c0_0 = arith.constant 0 : index
    %0 = vector.load %arg1[%c0, %c0_0] : memref<16x512xf32, #tpu.memory_space<vmem>>, vector<16x512xf32>
    %c0_1 = arith.constant 0 : index
    %c0_2 = arith.constant 0 : index
    %1 = vector.load %arg2[%c0_1, %c0_2] : memref<512x128xf32, #tpu.memory_space<vmem>>, vector<512x128xf32>
    %cst = arith.constant dense<0.000000e+00> : vector<16x128xf32>
    %2 = tpu.matmul %0, %1, %cst {dimension_numbers = #tpu.dot_dimension_numbers<[1], [0], [0], [1], [0, 0, 1, 1], [], []>} : vector<16x512xf32>, vector<512x128xf32>, vector<16x128xf32> -> vector<16x128xf32>
    %c0_3 = arith.constant 0 : index
    %c0_4 = arith.constant 0 : index
    %3 = vector.load %arg3[%c0_3, %c0_4] : memref<1x128xf32, #tpu.memory_space<vmem>>, vector<1x128xf32>
    %4 = vector.broadcast %3 : vector<1x128xf32> to vector<16x128xf32>
    %5 = arith.addf %2, %4 : vector<16x128xf32>
    %c0_5 = arith.constant 0 : index
    %c0_6 = arith.constant 0 : index
    %6 = vector.load %arg4[%c0_5, %c0_6] : memref<16x128xf32, #tpu.memory_space<vmem>>, vector<16x128xf32>
    %7 = arith.addf %5, %6 : vector<16x128xf32>
    %cst_7 = arith.constant dense<0.000000e+00> : vector<16xf32>
    %8 = vector.multi_reduction <add>, %7, %cst_7 [1] : vector<16x128xf32> to vector<16xf32>
    %9 = vector.shape_cast %8 : vector<16xf32> to vector<16x1xf32>
    %cst_8 = arith.constant 1.280000e+02 : f32
    %10 = vector.broadcast %cst_8 : f32 to vector<16x1xf32>
    %11 = arith.divf %9, %10 : vector<16x1xf32>
    %12 = vector.broadcast %11 : vector<16x1xf32> to vector<16x128xf32>
    %13 = arith.subf %7, %12 : vector<16x128xf32>
    %14 = arith.mulf %13, %13 : vector<16x128xf32>
    %cst_9 = arith.constant dense<0.000000e+00> : vector<16xf32>
    %15 = vector.multi_reduction <add>, %14, %cst_9 [1] : vector<16x128xf32> to vector<16xf32>
    %16 = vector.shape_cast %15 : vector<16xf32> to vector<16x1xf32>
    %cst_10 = arith.constant 1.280000e+02 : f32
    %17 = vector.broadcast %cst_10 : f32 to vector<16x1xf32>
    %18 = arith.divf %16, %17 : vector<16x1xf32>
    %c0_11 = arith.constant 0 : index
    %c0_12 = arith.constant 0 : index
    %19 = vector.load %arg5[%c0_11, %c0_12] : memref<1x128xf32, #tpu.memory_space<vmem>>, vector<1x128xf32>
    %c0_13 = arith.constant 0 : index
    %c0_14 = arith.constant 0 : index
    %20 = vector.load %arg6[%c0_13, %c0_14] : memref<1x128xf32, #tpu.memory_space<vmem>>, vector<1x128xf32>
    %cst_15 = arith.constant 9.99999996E-13 : f32
    %21 = vector.broadcast %cst_15 : f32 to vector<16x1xf32>
    %22 = arith.addf %18, %21 : vector<16x1xf32>
    %23 = math.rsqrt %22 : vector<16x1xf32>
    %24 = vector.broadcast %23 : vector<16x1xf32> to vector<16x128xf32>
    %25 = arith.mulf %13, %24 : vector<16x128xf32>
    %26 = vector.broadcast %19 : vector<1x128xf32> to vector<16x128xf32>
    %27 = arith.mulf %25, %26 : vector<16x128xf32>
    %28 = vector.broadcast %20 : vector<1x128xf32> to vector<16x128xf32>
    %29 = arith.addf %27, %28 : vector<16x128xf32>
    %c0_16 = arith.constant 0 : index
    %c0_17 = arith.constant 0 : index
    %30 = vector.load %arg7[%c0_16, %c0_17] : memref<16x128xf32, #tpu.memory_space<vmem>>, vector<16x128xf32>
    tpu.vector_store %arg7[%c0_16, %c0_17], %29 {strides = array<i32>} : memref<16x128xf32, #tpu.memory_space<vmem>>, vector<16x128xf32>,
    return
  }
  func.func @transform_0(%arg0: i32) -> (i32, i32) {
    %c0_i32 = arith.constant 0 : i32
    %c0_i32_0 = arith.constant 0 : i32
    return %arg0, %c0_i32 : i32, i32
  }
  func.func @transform_1(%arg0: i32) -> (i32, i32) {
    %c0_i32 = arith.constant 0 : i32
    %c0_i32_0 = arith.constant 0 : i32
    %c0_i32_1 = arith.constant 0 : i32
    return %c0_i32, %c0_i32_0 : i32, i32
  }
  func.func @transform_2(%arg0: i32) -> (i32, i32) {
    %c0_i32 = arith.constant 0 : i32
    %c0_i32_0 = arith.constant 0 : i32
    %c0_i32_1 = arith.constant 0 : i32
    return %c0_i32, %c0_i32_0 : i32, i32
  }
  func.func @transform_3(%arg0: i32) -> (i32, i32) {
    %c0_i32 = arith.constant 0 : i32
    %c0_i32_0 = arith.constant 0 : i32
    return %arg0, %c0_i32 : i32, i32
  }
  func.func @transform_4(%arg0: i32) -> (i32, i32) {
    %c0_i32 = arith.constant 0 : i32
    %c0_i32_0 = arith.constant 0 : i32
    %c0_i32_1 = arith.constant 0 : i32
    return %c0_i32, %c0_i32_0 : i32, i32
  }
  func.func @transform_5(%arg0: i32) -> (i32, i32) {
    %c0_i32 = arith.constant 0 : i32
    %c0_i32_0 = arith.constant 0 : i32
    %c0_i32_1 = arith.constant 0 : i32
    return %c0_i32, %c0_i32_0 : i32, i32
  }
  func.func @transform_6(%arg0: i32) -> (i32, i32) {
    %c0_i32 = arith.constant 0 : i32
    %c0_i32_0 = arith.constant 0 : i32
    return %arg0, %c0_i32 : i32, i32
  }
}

</mosaic_0001>

<bundles_post_ra>
// kernel: bert_layer.5
= control target key start
LH: loop header
LB: loop body
LE: loop exit
PB: predicated region body
PF: predicated region fallthrough
CT: control target
= control target key end

     0   :  { %8 = vsyncpa [#allocation3], 0  ;;  %s888_s0 = inlined_call_operand.hbm [shape: f32[16,128], index: 0, kind: input, shape index: {}]   ;;  %s889_s1 = inlined_call_operand.hbm [shape: f32[128,384], index: 1, kind: input, shape index: {}]   ;;  %s890_s2 = inlined_call_operand.vmem [shape: f32[1,384], index: 2, kind: input, shape index: {}]   ;;  %s891_s3 = inlined_call_operand.vmem [shape: f32[3,16,128], index: 3, kind: output, shape index: {}]  }
   0x1   :  { %9 = vsyncpa [#allocation5], 0 }
   0x2   :  { %11 = vsyncpa [#allocation5 + $0x1], 0  ;;  %s741_s12 = smov 0   ;;  %s743_s13 = smov 0  }
   0x3   :  { %s745_s14 = smov 0   ;;  %s747_s15 = smov 0  }
   0x4   :  { %s749_s16 = smov 0   ;;  %s751_s17 = smov 0  }
   0x5 LB: > { %s468_s18 = sadd.s32 4294967295, %s714_s17   ;;  %p69_p0 = scmp.ne.s32.totalorder %s702_s14, %s698_s13  ;;  %s714_s17 = sphi %s751_s17, %s17_s17   ;;  %s710_s16 = sphi %s749_s16, %s903_s16   ;;  %s706_s15 = sphi %s747_s15, %s902_s15   ;;  %s702_s14 = sphi %s745_s14, %s901_s14   ;;  %s698_s13 = sphi %s743_s13, %s900_s13   ;;  %s694_s12 = sphi %s741_s12, %s899_s12  }
   0x6   : > { %p70_p1 = scmp.eq.s32.totalorder %s714_s17, 0  ;;  %p75_p2 = scmp.ne.s32.totalorder %s698_s13, %s694_s12 }
   0x7   : > { %p774_p3 = scmp.eq.s32.totalorder %s468_s18, 0  ;;  %p470_p4 = scmp.ge.s32.totalorder %s714_s17, 1 }
   0x8   : > { %p71_p5 = por %p70_p1, %p69_p0  ;;  %p140_p6 = scmp.lt.s32.totalorder %s714_s17, 4 }
   0x9   : > { %p782_p7 = por %p774_p3, %p75_p2  ;;  %s716_s22 = smov [#allocation2]  }
   0xa   : > { %p786_p8 = pnand %p470_p4, %p140_p6  ;;  %s155_s23 = sshll.u32 %s716_s22, 4  ;;  %s156_s23 = int_to_ptr.vmem [resolvable:$true] %s155_s23 }
   0xb   : > { %s894_s20 = scalar_select %p782_p7, 1, 0 }
   0xc   : > { %p543_p9 = pneg %p786_p8  ;;  %p552_p11 = scmp.lt.s32.totalorder %s714_s17, 3 }
   0xd   : > { %s62_s25 = sadd.s32 1, %s702_s14  ;;  %s617_s27 = scalar_lea.vmem %s156_s23, 256 }
   0xe   : > { %p794_p10 = pnand %p543_p9, %p774_p3  ;;  %p800_p12 = pnand %p552_p11, %p71_p5 }
   0xf   : > { %p618_p0 = scmp.ne.s32.totalorder %s156_s23, %s617_s27  ;;  %p625_p4 = scmp.lt.s32.totalorder %s156_s23, %s156_s23 }
  0x10   : > { %p608_p13 = pneg %p794_p10  ;;  %p626_p6 = scmp.lt.s32.totalorder %s617_s27, %s617_s27 }
  0x12   : > { %p620_p1 = pnand %p618_p0, %p608_p13  ;;  %p627_p7 = por %p626_p6, %p625_p4 }
  0x14   : > { %p621_p2 = pneg %p620_p1 }
  0x16   : > { %p628_p9 = pnand %p627_p7, %p621_p2 }
  0x18   : > { %631 = shalt.err (!%p628_p9)
}
  0x19   : > { %s717_s28 = smov 128   ;;  %s718_s29 = smov 8  }
  0x1a   : > { %546 = dma.hbm_to_vmem [thread:$0]  (!%p794_p10), %s888_s0, 256, %s156_s23, [#allocation3], %s717_s28, %s717_s28, %s718_s29  }
  0x1b   : > { %s26_s5 = sadd.s32 1, %s710_s16  ;;  %s169_s6 = sand.u32 1, %s702_s14  }
  0x1c   : > { %p27_p5 = scmp.ge.s32.totalorder %s26_s5, 3  ;;  %s473_s7 = sshll.u32 %s169_s6, 7 }
  0x1d   : > { %s474_s8 = sshll.u32 %s710_s16, 7  ;;  %s173_s18 = scalar_lea.vmem [#allocation4], %s473_s7 }
  0x1e   : > { %s905_s5 = smov (%p27_p5, %s26_s5), 0  ;;  %s178_s11 = scalar_lea.hbm %s889_s1, %s474_s8 }
  0x1f   : > { %s59_s12 = ssub.s32 %s710_s16, %s905_s5  ;;  %s179_s22 = sshll.u32 %s173_s18, 4  ;;  %s180_s22 = int_to_ptr.vmem [resolvable:$true] %s179_s22 }
  0x20   : > { %p60_p7 = scmp.eq.s32.totalorder %s59_s12, 0  ;;  %s170_s23 = scalar_lea.sflag [#allocation5], %s169_s6 }
  0x21   : > { %p634_p10 = pneg %p800_p12  ;;  %s645_s27 = scalar_lea.vmem %s180_s22, 2048 }
  0x22   : > { %s825_s24 = scalar_select %p60_p7, %s702_s14, %s62_s25  }
  0x23   : > { %p646_p11 = scmp.ne.s32.totalorder %s180_s22, %s645_s27  ;;  %s719_s30 = smov [#allocation4]  }
  0x24   : > { %s650_s4 = sshll.u32 %s719_s30, 4  ;;  %s651_s4 = int_to_ptr.vmem [resolvable:$false] %s650_s4 }
  0x25   : > { %p648_p13 = pnand %p646_p11, %p634_p10  ;;  %s652_s9 = scalar_lea.vmem %s651_s4, 4096 }
  0x26   : > { %p653_p1 = scmp.lt.s32.totalorder %s180_s22, %s651_s4  ;;  %p654_p2 = scmp.lt.s32.totalorder %s652_s9, %s645_s27 }
  0x27   : > { %p649_p0 = pneg %p648_p13 }
  0x28   : > { %p655_p4 = por %p654_p2, %p653_p1 }
  0x2a   : > { %p656_p6 = pnand %p655_p4, %p649_p0 }
  0x2c   : > { %659 = shalt.err (!%p656_p6)
}
  0x2d   : > { %s720_s7 = smov 384   ;;  %197 = sbr.rel (%p786_p8) target bundleno = 286 (0x11e), region = 32 }
  0x2e   : > { %550 = dma.hbm_to_vmem [thread:$0]  (!%p800_p12), %s178_s11, 2048, %s180_s22, %s170_s23, %s720_s7, %s717_s28, %s718_s29  }
  0x32   : > { %685 = dma.done.wait (%p774_p3), [#allocation3], 256  }
  0x33   : > { %687 = vsyncadd (%p774_p3), [#allocation3], 4294967040  ;;  %s203_s25 = sand.u32 1, %s698_s13   ;;  %p898_p9 = scmp.ne.s32.totalorder %s894_s20, 0 }
  0x34   : > { %s477_s6 = sshll.u32 %s203_s25, 7  ;;  %s204_s8 = scalar_lea.sflag [#allocation5], %s203_s25 }
  0x35   : > { %s840_s10 = scalar_lea.vmem [#allocation4], %s477_s6 }
  0x36   : > { %689 = dma.done.wait (%p898_p9), %s204_s8, 2048  }
  0x37   : > { %691 = vsyncadd (%p898_p9), %s204_s8, 4294965248  ;;  %v268_v0 = vld [vmem:[%s840_s10 + $0x78] sm:$0xff]  ;;  %v267_v1 = vld [vmem:[%s840_s10 + $0x70] sm:$0xff]  ;;  %p238_p3 = scmp.lt.s32.totalorder %s706_s15, 2 }
  0x38   : > { %502 = vmatprep.subr.mxu0 %v268_v0  ;;  %v266_v2 = vld [vmem:[%s840_s10 + $0x68] sm:$0xff]  ;;  %v265_v3 = vld [vmem:[%s840_s10 + $0x60] sm:$0xff]  ;;  %v251_v4 = vld [vmem:[#allocation2] sm:$0xff] }
  0x39   : > { %503 = vmatpush3.msra.mxu0 %v268_v0  ;;  %v264_v5 = vld [vmem:[%s840_s10 + $0x58] sm:$0xff]  ;;  %534 = vmatprep.mubr.f32.mxu0 %v251_v4  ;;  %v263_v6 = vld [vmem:[%s840_s10 + $0x50] sm:$0xff]  ;;  %v262_v7 = vld [vmem:[%s840_s10 + $0x48] sm:$0xff]  ;;  %s907_s15 = smov (!%p238_p3, %s706_s15), 2 }
  0x3a   : > { %504 = vmatprep.subr.mxu0 %v267_v1  ;;  %v261_v8 = vld [vmem:[%s840_s10 + $0x40] sm:$0xff]  ;;  %v260_v9 = vld [vmem:[%s840_s10 + $0x38] sm:$0xff]  ;;  %v259_v10 = vld [vmem:[%s840_s10 + $0x30] sm:$0xff]  ;;  %s240_s21 = scalar_lea.vmem %s890_s2, %s907_s15  ;;  %s483_s26 = sshll.u32 %s907_s15, 4 }
  0x3b   : > { %505 = vmatpush3.msra.mxu0 %v267_v1  ;;  %v258_v11 = vld [vmem:[%s840_s10 + $0x28] sm:$0xff]  ;;  %v257_v12 = vld [vmem:[%s840_s10 + $0x20] sm:$0xff]  ;;  %v256_v13 = vld [vmem:[%s840_s10 + $0x18] sm:$0xff]  ;;  %s249_s11 = scalar_lea.vmem %s891_s3, %s483_s26 }
  0x3c   : > { %506 = vmatprep.subr.mxu0 %v266_v2  ;;  %v255_v14 = vld [vmem:[%s840_s10 + $0x10] sm:$0xff]  ;;  %v254_v15 = vld [vmem:[%s840_s10 + $0x8] sm:$0xff]  ;;  %v253_v16 = vld [vmem:[%s840_s10] sm:$0xff] }
  0x3d   : > { %507 = vmatpush3.msra.mxu0 %v266_v2  ;;  %v252_v17 = vld [vmem:[#allocation2 + $0x8] sm:$0xff]  ;;  %v480_v18 = vld [vmem:[%s240_s21] ss:$0 sm:$0xff] }
  0x3e   : > { %508 = vmatprep.subr.mxu0 %v265_v3 }
  0x3f   : > { %509 = vmatpush3.msra.mxu0 %v265_v3 }
  0x40   : > { %510 = vmatprep.subr.mxu0 %v264_v5 }
  0x41   : > { %511 = vmatpush3.msra.mxu0 %v264_v5 }
  0x42   : > { %512 = vmatprep.subr.mxu0 %v263_v6 }
  0x43   : > { %513 = vmatpush3.msra.mxu0 %v263_v6 }
  0x44   : > { %514 = vmatprep.subr.mxu0 %v262_v7 }
  0x45   : > { %515 = vmatpush3.msra.mxu0 %v262_v7 }
  0x46   : > { %516 = vmatprep.subr.mxu0 %v261_v8 }
  0x47   : > { %517 = vmatpush3.msra.mxu0 %v261_v8 }
  0x48   : > { %518 = vmatprep.subr.mxu0 %v260_v9 }
  0x49   : > { %519 = vmatpush3.msra.mxu0 %v260_v9 }
  0x4a   : > { %520 = vmatprep.subr.mxu0 %v259_v10 }
  0x4b   : > { %521 = vmatpush3.msra.mxu0 %v259_v10 }
  0x4c   : > { %522 = vmatprep.subr.mxu0 %v258_v11 }
  0x4d   : > { %523 = vmatpush3.msra.mxu0 %v258_v11 }
  0x4e   : > { %524 = vmatprep.subr.mxu0 %v257_v12 }
  0x4f   : > { %525 = vmatpush3.msra.mxu0 %v257_v12 }
  0x50   : > { %526 = vmatprep.subr.mxu0 %v256_v13 }
  0x51   : > { %527 = vmatpush3.msra.mxu0 %v256_v13 }
  0x52   : > { %528 = vmatprep.subr.mxu0 %v255_v14 }
  0x53   : > { %529 = vmatpush3.msra.mxu0 %v255_v14 }
  0x54   : > { %530 = vmatprep.subr.mxu0 %v254_v15 }
  0x55   : > { %531 = vmatpush3.msra.mxu0 %v254_v15 }
  0x56   : > { %532 = vmatprep.subr.mxu0 %v253_v16 }
  0x57   : > { %533 = vmatpush3.msra.mxu0 %v253_v16 }
  0x58   : > { %535 = vmatmul.mubr.f32.vlgmr.msra.gmra.mxu0 %v252_v17 }
 0x118   : > { %v536_v19 = vpop.f32.mrf.mxu0 }
 0x119   : > { %v348_v20 = vadd.f32 %v536_v19, %v480_v18 }
 0x11a   : > { %v342_v21 = vpop.f32.mrf.mxu0 }
 0x11b   : > { %352 = vst [vmem:[%s249_s11 + $0x8] sm:$0xff] %v348_v20  ;;  %v343_v22 = vadd.f32 %v480_v18, %v342_v21 }
 0x11d   : > { %351 = vst [vmem:[%s249_s11] sm:$0xff] %v343_v22 }
 0x11e PF: > { %s17_s17 = sadd.s32 1, %s714_s17   ;;  %s899_s12 = smov %s698_s13 }
 0x11f   : > { %p14_p8 = scmp.ge.s32.totalorder %s17_s17, 5   ;;  %s900_s13 = smov %s702_s14 }
 0x120   : > { %s901_s14 = smov %s825_s24  ;;  %s902_s15 = smov %s710_s16 }
 0x121   : > { %s903_s16 = smov %s905_s5  ;;  %16 = sbr.rel (!%p14_p8) target bundleno = 5 (0x5), region = 81 }
 0x126   :  { %383 = vsyncpa [#allocation3], 1 }
 0x127   :  { %385 = vsyncpa [#allocation3 + $0x1], 1 }
 0x128   :  { %386 = vsyncpa [#allocation5], 1 }
 0x129   :  { %388 = vsyncpa [#allocation5 + $0x1], 1 }

// kernel: bert_layer.7
= control target key start
LH: loop header
LB: loop body
LE: loop exit
PB: predicated region body
PF: predicated region fallthrough
CT: control target
= control target key end

     0   :  { %11 = vsyncpa [#allocation3], 0  ;;  %s421_s0 = inlined_call_operand.vmem [shape: f32[16,128], index: 0, kind: input, shape index: {}]   ;;  %s422_s1 = inlined_call_operand.vmem [shape: f32[128,128], index: 1, kind: input, shape index: {}]   ;;  %s423_s2 = inlined_call_operand.vmem [shape: f32[1,128], index: 2, kind: input, shape index: {}]   ;;  %s424_s3 = inlined_call_operand.hbm [shape: f32[16,128], index: 3, kind: input, shape index: {}]   ;;  %s425_s4 = inlined_call_operand.vmem [shape: f32[1,128], index: 4, kind: input, shape index: {}]   ;;  %s426_s5 = inlined_call_operand.hbm [shape: f32[1,128], index: 5, kind: input, shape index: {}]   ;;  %s427_s6 = inlined_call_operand.vmem [shape: f32[16,128], index: 6, kind: output, shape index: {}]  }
   0x1   :  { %12 = vsyncpa [#allocation5], 0  ;;  %s310_s21 = smov [#allocation2]  }
   0x2   :  { %s24_s22 = sshll.u32 %s310_s21, 4  ;;  %s25_s22 = int_to_ptr.vmem [resolvable:$true] %s24_s22 }
   0x3   :  { %s274_s23 = scalar_lea.vmem %s25_s22, 256  ;;  %p279_p1 = scmp.lt.s32.totalorder %s25_s22, %s25_s22 }
   0x4   :  { %p275_p0 = scmp.ne.s32.totalorder %s25_s22, %s274_s23  ;;  %p280_p2 = scmp.lt.s32.totalorder %s274_s23, %s274_s23 }
   0x6   :  { %p281_p3 = por %p280_p2, %p279_p1 }
   0x8   :  { %p282_p4 = pnand %p281_p3, %p275_p0 }
   0xa   :  { %285 = shalt.err (!%p282_p4)
}
   0xb   :  { %s311_s24 = smov 128   ;;  %s312_s25 = smov 8  }
   0xc   :  { %30 = dma.hbm_to_vmem [thread:$0]  %s424_s3, 256, %s25_s22, [#allocation3], %s311_s24, %s311_s24, %s312_s25  }
   0xd   :  { %s313_s28 = smov [#allocation4]  }
   0xe   :  { %s39_s29 = sshll.u32 %s313_s28, 4  ;;  %s40_s29 = int_to_ptr.vmem [resolvable:$true] %s39_s29 }
   0xf   :  { %s294_s30 = scalar_lea.vmem %s40_s29, 16  ;;  %s298_s7 = scalar_lea.vmem %s40_s29, 32 }
  0x10   :  { %p295_p5 = scmp.ne.s32.totalorder %s40_s29, %s294_s30  ;;  %p299_p6 = scmp.lt.s32.totalorder %s40_s29, %s40_s29 }
  0x11   :  { %p300_p7 = scmp.lt.s32.totalorder %s298_s7, %s294_s30 }
  0x13   :  { %p301_p8 = por %p300_p7, %p299_p6 }
  0x15   :  { %p302_p9 = pnand %p301_p8, %p295_p5 }
  0x17   :  { %305 = shalt.err (!%p302_p9)
}
  0x18   :  { %42 = dma.hbm_to_vmem [thread:$0]  %s426_s5, 16, %s40_s29, [#allocation5]  }
  0x19   :  { %306 = dma.done.wait [#allocation3], 256  }
  0x1a   :  { %307 = vsyncadd [#allocation3], 4294967040 }
  0x1b   :  { %308 = dma.done.wait [#allocation5], 16  }
  0x1c   :  { %309 = vsyncadd [#allocation5], 4294967280  ;;  %v66_v0 = vld [vmem:[%s422_s1 + $0x78] sm:$0xff]  ;;  %v65_v1 = vld [vmem:[%s422_s1 + $0x70] sm:$0xff] }
  0x1d   :  { %223 = vmatprep.subr.mxu0 %v66_v0  ;;  %v64_v2 = vld [vmem:[%s422_s1 + $0x68] sm:$0xff]  ;;  %v63_v3 = vld [vmem:[%s422_s1 + $0x60] sm:$0xff]  ;;  %v62_v5 = vld [vmem:[%s422_s1 + $0x58] sm:$0xff] }
  0x1e   :  { %224 = vmatpush3.msra.mxu0 %v66_v0  ;;  %v49_v4 = vld [vmem:[%s421_s0] sm:$0xff]  ;;  %v61_v6 = vld [vmem:[%s422_s1 + $0x50] sm:$0xff]  ;;  %v60_v7 = vld [vmem:[%s422_s1 + $0x48] sm:$0xff] }
  0x1f   :  { %225 = vmatprep.subr.mxu0 %v65_v1  ;;  %255 = vmatprep.mubr.f32.mxu0 %v49_v4  ;;  %v59_v8 = vld [vmem:[%s422_s1 + $0x40] sm:$0xff]  ;;  %v58_v9 = vld [vmem:[%s422_s1 + $0x38] sm:$0xff]  ;;  %v57_v10 = vld [vmem:[%s422_s1 + $0x30] sm:$0xff] }
  0x20   :  { %226 = vmatpush3.msra.mxu0 %v65_v1  ;;  %v56_v11 = vld [vmem:[%s422_s1 + $0x28] sm:$0xff]  ;;  %v55_v12 = vld [vmem:[%s422_s1 + $0x20] sm:$0xff]  ;;  %v54_v13 = vld [vmem:[%s422_s1 + $0x18] sm:$0xff] }
  0x21   :  { %227 = vmatprep.subr.mxu0 %v64_v2  ;;  %v53_v14 = vld [vmem:[%s422_s1 + $0x10] sm:$0xff]  ;;  %v52_v15 = vld [vmem:[%s422_s1 + $0x8] sm:$0xff]  ;;  %v51_v16 = vld [vmem:[%s422_s1] sm:$0xff] }
  0x22   :  { %228 = vmatpush3.msra.mxu0 %v64_v2  ;;  %v50_v17 = vld [vmem:[%s421_s0 + $0x8] sm:$0xff]  ;;  %v202_v19 = vld [vmem:[%s423_s2] ss:$0 sm:$0xff]  ;;  %v204_v44 = vld [vmem:[#allocation4] ss:$0 sm:$0xff] }
  0x23   :  { %229 = vmatprep.subr.mxu0 %v63_v3  ;;  %v149_v21 = vld [vmem:[#allocation2] sm:$0xff]  ;;  %v150_v25 = vld [vmem:[#allocation2 + $0x8] sm:$0xff] }
  0x24   :  { %230 = vmatpush3.msra.mxu0 %v63_v3  ;;  %v203_v42 = vld [vmem:[%s425_s4] ss:$0 sm:$0xff] }
  0x25   :  { %231 = vmatprep.subr.mxu0 %v62_v5 }
  0x26   :  { %232 = vmatpush3.msra.mxu0 %v62_v5 }
  0x27   :  { %233 = vmatprep.subr.mxu0 %v61_v6 }
  0x28   :  { %234 = vmatpush3.msra.mxu0 %v61_v6 }
  0x29   :  { %235 = vmatprep.subr.mxu0 %v60_v7 }
  0x2a   :  { %236 = vmatpush3.msra.mxu0 %v60_v7 }
  0x2b   :  { %237 = vmatprep.subr.mxu0 %v59_v8 }
  0x2c   :  { %238 = vmatpush3.msra.mxu0 %v59_v8 }
  0x2d   :  { %239 = vmatprep.subr.mxu0 %v58_v9 }
  0x2e   :  { %240 = vmatpush3.msra.mxu0 %v58_v9 }
  0x2f   :  { %241 = vmatprep.subr.mxu0 %v57_v10 }
  0x30   :  { %242 = vmatpush3.msra.mxu0 %v57_v10 }
  0x31   :  { %243 = vmatprep.subr.mxu0 %v56_v11 }
  0x32   :  { %244 = vmatpush3.msra.mxu0 %v56_v11 }
  0x33   :  { %245 = vmatprep.subr.mxu0 %v55_v12 }
  0x34   :  { %246 = vmatpush3.msra.mxu0 %v55_v12 }
  0x35   :  { %247 = vmatprep.subr.mxu0 %v54_v13 }
  0x36   :  { %248 = vmatpush3.msra.mxu0 %v54_v13 }
  0x37   :  { %249 = vmatprep.subr.mxu0 %v53_v14 }
  0x38   :  { %250 = vmatpush3.msra.mxu0 %v53_v14 }
  0x39   :  { %251 = vmatprep.subr.mxu0 %v52_v15 }
  0x3a   :  { %252 = vmatpush3.msra.mxu0 %v52_v15 }
  0x3b   :  { %253 = vmatprep.subr.mxu0 %v51_v16 }
  0x3c   :  { %254 = vmatpush3.msra.mxu0 %v51_v16 }
  0x3d   :  { %256 = vmatmul.mubr.f32.vlgmr.msra.gmra.mxu0 %v50_v17 }
  0xfd   :  { %v257_v18 = vpop.f32.mrf.mxu0 }
  0xfe   :  { %v146_v23 = vadd.f32 %v257_v18, %v202_v19 }
  0xff   :  { %v140_v20 = vpop.f32.mrf.mxu0 }
 0x100   :  { %v141_v22 = vadd.f32 %v202_v19, %v140_v20  ;;  %v152_v26 = vadd.f32 %v150_v25, %v146_v23 }
 0x102   :  { %v151_v24 = vadd.f32 %v149_v21, %v141_v22 }
 0x104   :  { %153 = vadd.xlane.f32.xlu0 %v151_v24 }
 0x108   :  { %155 = vadd.xlane.f32.xlu0 %v152_v26 }
 0x18d   :  { %v154_v27 = vpop.xlane.xlu0 %153 }
 0x18e   :  { %v158_v28 = vmul.f32 0.0078125, %v154_v27 }
 0x190   :  { %v160_v29 = vsub.f32 %v151_v24, %v158_v28 }
 0x191   :  { %v156_v30 = vpop.xlane.xlu0 %155 }
 0x192   :  { %v159_v31 = vmul.f32 0.0078125, %v156_v30  ;;  %v162_v32 = vmul.f32 %v160_v29, %v160_v29 }
 0x194   :  { %v161_v33 = vsub.f32 %v152_v26, %v159_v31  ;;  %164 = vadd.xlane.f32.xlu1 %v162_v32 }
 0x196   :  { %v163_v34 = vmul.f32 %v161_v33, %v161_v33 }
 0x198   :  { %166 = vadd.xlane.f32.xlu1 %v163_v34 }
 0x21d   :  { %v165_v35 = vpop.xlane.xlu1 %164 }
 0x21e   :  { %v168_v36 = vmul.f32 0.0078125, %v165_v35 }
 0x220   :  { %v172_v37 = vadd.f32 1e-12, %v168_v36 }
 0x221   :  { %v167_v38 = vpop.xlane.xlu1 %166 }
 0x222   :  { %262 = vrsqrt.f32 %v172_v37  ;;  %v169_v39 = vmul.f32 0.0078125, %v167_v38 }
 0x224   :  { %v173_v40 = vadd.f32 1e-12, %v169_v39 }
 0x226   :  { %264 = vrsqrt.f32 %v173_v40 }
 0x22f   :  { %v263_v41 = vpop.eup %262 }
 0x230   :  { %v176_v43 = vmul.f32 %v263_v41, %v160_v29 }
 0x232   :  { %v184_v45 = vmul.f32 %v203_v42, %v176_v43 }
 0x233   :  { %v265_v46 = vpop.eup %264 }
 0x234   :  { %v192_v47 = vadd.f32 %v204_v44, %v184_v45  ;;  %v177_v48 = vmul.f32 %v265_v46, %v161_v33 }
 0x236   :  { %194 = vst [vmem:[%s427_s6] sm:$0xff] %v192_v47  ;;  %v185_v49 = vmul.f32 %v203_v42, %v177_v48 }
 0x238   :  { %v193_v50 = vadd.f32 %v204_v44, %v185_v49 }
 0x23a   :  { %195 = vst [vmem:[%s427_s6 + $0x8] sm:$0xff] %v193_v50 }
 0x23b   :  { %200 = vsyncpa [#allocation3], 1 }
 0x23c   :  { %201 = vsyncpa [#allocation5], 1 }

// kernel: bert_layer.6
= control target key start
LH: loop header
LB: loop body
LE: loop exit
PB: predicated region body
PF: predicated region fallthrough
CT: control target
= control target key end

     0   :  { %11 = vsyncpa [#allocation3], 0  ;;  %s1824_s0 = inlined_call_operand.vmem [shape: f32[3,2,8,128], index: 0, kind: input, shape index: {}, may-alias: {0,1,2}]   ;;  %s1825_s1 = inlined_call_operand.vmem [shape: f32[3,2,8,128], index: 1, kind: input, shape index: {}, may-alias: {0,1,2}]   ;;  %s1826_s2 = inlined_call_operand.vmem [shape: f32[3,2,8,128], index: 2, kind: input, shape index: {}, may-alias: {0,1,2}]   ;;  %s1827_s3 = inlined_call_operand.hbm [shape: f32[2,1,8], index: 3, kind: input, shape index: {}]   ;;  %s1828_s4 = inlined_call_operand.hbm [shape: f32[2,4,8,8], index: 4, kind: output, shape index: {0}]   ;;  %s1829_s5 = inlined_call_operand.vmem [shape: f32[2,8,128], index: 5, kind: output, shape index: {1}]  }
   0x1   :  { %13 = vsyncpa [#allocation3 + $0x1], 0 }
   0x2   :  { %14 = vsyncpa [#allocation4], 0 }
   0x3   :  { %16 = vsyncpa [#allocation4 + $0x1], 0  ;;  %s1569_s18 = smov 0   ;;  %s1571_s19 = smov 0  }
   0x4   :  { %s1573_s20 = smov 0   ;;  %s1575_s21 = smov 0  }
   0x5   :  { %s1577_s22 = smov 0   ;;  %s1579_s23 = smov 0  }
   0x6 LB: > { %s1238_s24 = sadd.s32 4294967295, %s1528_s23   ;;  %s1239_s25 = sadd.s32 4294967294, %s1528_s23   ;;  %s1528_s23 = sphi %s1579_s23, %s22_s23   ;;  %s1524_s22 = sphi %s1577_s22, %s1841_s22   ;;  %s1520_s21 = sphi %s1575_s21, %s1840_s21   ;;  %s1516_s20 = sphi %s1573_s20, %s1839_s20   ;;  %s1512_s19 = sphi %s1571_s19, %s1838_s19   ;;  %s1508_s18 = sphi %s1569_s18, %s1837_s18  }
   0x7   : > { %s34_s26 = sadd.s32 1, %s1524_s22  ;;  %s121_s27 = sadd.s32 1, %s1516_s20 }
   0x8   : > { %p36_p0 = scmp.ge.s32.totalorder %s34_s26, 2  ;;  %p128_p1 = scmp.ne.s32.totalorder %s1516_s20, %s1512_s19 }
   0x9   : > { %p129_p2 = scmp.eq.s32.totalorder %s1528_s23, 0  ;;  %p134_p3 = scmp.ne.s32.totalorder %s1512_s19, %s1508_s18 }
   0xa   : > { %s1843_s26 = smov (%p36_p0, %s34_s26), 0  ;;  %p135_p5 = scmp.eq.s32.totalorder %s1238_s24, 0 }
   0xb   : > { %p1610_p4 = por %p129_p2, %p128_p1  ;;  %s118_s29 = ssub.s32 %s1524_s22, %s1843_s26 }
   0xc   : > { %p160_p6 = scmp.eq.s32.totalorder %s1238_s24, 1  ;;  %p119_p7 = scmp.eq.s32.totalorder %s118_s29, 0 }
   0xd   : > { %p1616_p8 = por %p135_p5, %p134_p3  ;;  %p166_p10 = scmp.eq.s32.totalorder %s1239_s25, 1 }
   0xe   : > { %p1620_p9 = por %p160_p6, %p128_p1  ;;  %p1347_p13 = scmp.lt.s32.totalorder %s1528_s23, 2 }
   0xf   : > { %s1625_s7 = scalar_select %p119_p7, %s1516_s20, %s121_s27  }
  0x10   : > { %p1627_p11 = por %p166_p10, %p134_p3  ;;  %s240_s9 = sand.u32 1, %s1516_s20  }
  0x11   : > { %s1242_s10 = sshll.u32 %s1524_s22, 4  ;;  %s243_s11 = scalar_lea.vmem [#allocation2], %s240_s9 }
  0x12   : > { %s1833_s8 = scalar_select %p1627_p11, 1, 0 }
  0x13   : > { %s250_s12 = sshll.u32 %s243_s11, 4  ;;  %s248_s15 = scalar_lea.hbm %s1827_s3, %s1242_s10  ;;  %s251_s12 = int_to_ptr.vmem [resolvable:$true] %s250_s12 }
  0x14   : > { %p1640_p0 = pnand %p1347_p13, %p1610_p4  ;;  %p1243_p1 = scmp.ge.s32.totalorder %s1528_s23, 1 }
  0x15   : > { %p255_p2 = scmp.lt.s32.totalorder %s1528_s23, 3  ;;  %s241_s17 = scalar_lea.sflag [#allocation3], %s240_s9 }
  0x16   : > { %p1422_p3 = pneg %p1640_p0  ;;  %s1433_s24 = scalar_lea.vmem %s251_s12, 16 }
  0x17   : > { %p1434_p5 = scmp.ne.s32.totalorder %s251_s12, %s1433_s24  ;;  %s1530_s25 = smov [#allocation2]  }
  0x18   : > { %s1438_s27 = sshll.u32 %s1530_s25, 4  ;;  %s1439_s27 = int_to_ptr.vmem [resolvable:$false] %s1438_s27 }
  0x19   : > { %p1436_p6 = pnand %p1434_p5, %p1422_p3  ;;  %s1440_s29 = scalar_lea.vmem %s1439_s27, 32 }
  0x1a   : > { %p1441_p10 = scmp.lt.s32.totalorder %s251_s12, %s1439_s27  ;;  %p1442_p12 = scmp.lt.s32.totalorder %s1440_s29, %s1433_s24 }
  0x1b   : > { %p1437_p7 = pneg %p1436_p6 }
  0x1c   : > { %p1443_p4 = por %p1442_p12, %p1441_p10 }
  0x1e   : > { %p1444_p13 = pnand %p1443_p4, %p1437_p7 }
  0x20   : > { %1447 = shalt.err (!%p1444_p13)
}
  0x21   : > { %1342 = dma.hbm_to_vmem [thread:$0]  (!%p1640_p0), %s248_s15, 16, %s251_s12, %s241_s17  }
  0x22   : > { %p256_p11 = pnand %p1243_p1, %p255_p2 }
  0x23   : > { %s1655_s28 = sand.u32 (!%p256_p11), 1, %s1512_s19  }
  0x24   : > { %259 = sbr.rel (%p256_p11) target bundleno = 1436 (0x59c), region = 36  ;;  %s262_s9 = scalar_lea.sflag (!%p256_p11), [#allocation3], %s1655_s28 }
  0x25   : > { %s264_s10 = scalar_lea.vmem (!%p256_p11), [#allocation2], %s1655_s28 }
  0x29   : > { %1499 = dma.done.wait (%p1616_p8), %s262_s9, 16  }
  0x2a   : > { %1501 = vsyncadd (%p1616_p8), %s262_s9, 4294967280  ;;  %p314_p12 = scmp.lt.s32.totalorder %s1520_s21, 1  ;;  %v1531_v0 = vmov 0.0   ;;  %vm1532_vm0 = vmmov 0   ;;  %vm341_vm1 = vcmask 261120   ;;  %vm426_vm2 = vcmask 64512  }
  0x2b   : > { %1295 = vmatprep.subr.mxu0 %v1531_v0  ;;  %1297 = vmatprep.mubr.msk.f32.mxu0 %vm1532_vm0, %v1531_v0  ;;  %v1686_v4 = vld [vmem:[%s264_s10] ss:$0 sm:$0xff]  ;;  %s1533_s24 = smov 96   ;;  %s1534_s25 = smov 64  }
  0x2c   : > { %s315_s11 = scalar_select %p314_p12, %s1520_s21, 1  ;;  %1300 = vmatprep.subr.mxu1 %v1531_v0  ;;  %1302 = vmatprep.mubr.msk.f32.mxu1 %vm1532_vm0, %v1531_v0 }
  0x2d   : > { %s1535_s27 = smov 32  }
  0x2e   : > { %s1671_s12 = sshll.u32 %s315_s11, 3  ;;  %s1244_s11 = sshll.u32 %s1655_s28, 5 }
  0x2f   : > { %s1155_s14 = scalar_lea.vmem %s1825_s1, %s1671_s12  ;;  %s320_s17 = scalar_lea.vmem %s1824_s0, %s1671_s12 }
  0x30   : > { %v1249_v1 = vld [vmem:[%s1155_s14 + $0x10] sm:$0xff]  ;;  %v339_v2 = vld [vmem:[%s320_s17] sm:$0xff]  ;;  %s1158_s10 = scalar_lea.vmem %s1826_s2, %s1671_s12  ;;  %s1706_s30 = scalar_lea.vmem [#allocation5], %s1244_s11 }
  0x31   : > { %1296 = vmatpush3.xpose.msk.msra.mxu0 %vm341_vm1, %v1249_v1  ;;  %520 = vrot.lane.b32.xlu1 %v1249_v1, %s1533_s24  ;;  %v1700_v14 = vld [vmem:[%s1158_s10 + $0x20] sm:$0xff]  ;;  %s1729_s15 = scalar_lea.vmem %s1829_s5, %s1671_s12  ;;  %s1278_s12 = sshll.u32 %s1520_s21, 9 }
  0x32   : > { %1310 = vmatprep.subr.mxu0 %v1531_v0  ;;  %1301 = vmatpush3.msra.mxu1 %v1700_v14  ;;  %s1079_s16 = sshll.u32 %s1706_s30, 4  ;;  %s1770_s9 = scalar_lea.hbm %s1828_s4, %s1278_s12  ;;  %s1772_s16 = int_to_ptr.vmem [resolvable:$true] %s1079_s16 }
  0x33   : > { %1305 = vmatprep.subr.mxu1 %v1531_v0  ;;  %s1058_s10 = scalar_lea.sflag [#allocation4], %s1655_s28  ;;  %s1448_s11 = scalar_lea.vmem %s1772_s16, 512 }
  0x34   : > { %1298 = vmatmul.mubr.msk.f32.vlgmr.msra.gmra.mxu0 %vm341_vm1, %v339_v2  ;;  %p1449_p8 = scmp.ne.s32.totalorder %s1772_s16, %s1448_s11 }
  0x35   : > { %1312 = vmatprep.mubr.msk.f32.mxu0 %vm1532_vm0, %v1531_v0  ;;  %517 = vrot.lane.b32.xlu1 %v339_v2, %s1533_s24 }
  0x36   : > { %p1450_p11 = pnand %p1449_p8, %p1620_p9 }
  0x38   : > { %p1451_p0 = pneg %p1450_p11 }
  0x39   : > { %698 = vrot.lane.b32.xlu1 %v339_v2, %s1534_s25 }
  0x3d   : > { %882 = vrot.lane.b32.xlu1 %v1249_v1, %s1535_s27 }
  0x41   : > { %879 = vrot.lane.b32.xlu1 %v339_v2, %s1535_s27 }
  0xa3   : > { %v521_v16 = vpop.permute.xlu1 %520 }
  0xa7   : > { %v518_v17 = vpop.permute.xlu1 %517 }
  0xab   : > { %v699_v19 = vpop.permute.xlu1 %698 }
  0xaf   : > { %v883_v22 = vpop.permute.xlu1 %882 }
  0xb3   : > { %v880_v23 = vpop.permute.xlu1 %879 }
  0xf4   : > { %v414_v3 = vpop.f32.mrf.mxu0 }
  0xf5   : > { %v418_v5 = vmul.f32 0.17677669, %v414_v3 }
  0xf6   : > { %v1299_v6 = vpop.f32.mrf.mxu0 }
  0xf7   : > { %v425_v7 = vadd.f32 %v1686_v4, %v418_v5 }
  0xf9   : > { %v427_v8 = vsel %vm426_vm2, %v425_v7, -inf }
  0xfa   : > { %428 = vmax.xlane.f32.xlu0 %v427_v8 }
 0x183   : > { %v429_v9 = vpop.xlane.xlu0 %428 }
 0x184   : > { %v430_v10 = vsub.f32 %v425_v7, %v429_v9 }
 0x186   : > { %v431_v11 = vmul.f32 1.442695, %v430_v10 }
 0x188   : > { %1404 = vpow2.f32 %v431_v11 }
 0x195   : > { %v1405_v12 = vpop.eup %1404 }
 0x196   : > { %v433_v13 = vsel %vm426_vm2, %v1405_v12, 0.0 }
 0x197   : > { %434 = vadd.xlane.f32.xlu0 %v433_v13 }
 0x1ad   : > { %701 = vrot.lane.b32.xlu0 %v1249_v1, %s1534_s25 }
 0x220   : > { %v435_v15 = vpop.xlane.xlu0 %434 }
 0x221   : > { %1406 = vrcp.f32 %v435_v15 }
 0x224   : > { %v702_v21 = vpop.permute.xlu0 %701 }
 0x22e   : > { %v1407_v18 = vpop.eup %1406 }
 0x22f   : > { %v437_v20 = vmul.f32 %v1407_v18, %v1405_v12 }
 0x231   : > { %438 = vst.msk [vmem:[%s1706_s30] sm:$0xff] %vm426_vm2, %v437_v20  ;;  %1303 = vmatmul.mubr.msk.f32.vlgmr.msra.gmra.mxu1 %vm426_vm2, %v437_v20 }
 0x232   : > { %1306 = vmatpush3.xpose.msk.msra.mxu1 %vm341_vm1, %v521_v16  ;;  %1307 = vmatprep.mubr.msk.f32.mxu1 %vm1532_vm0, %v1531_v0 }
 0x233   : > { %1315 = vmatprep.subr.mxu1 %v1531_v0 }
 0x235   : > { %1308 = vmatmul.mubr.msk.f32.vlgmr.msra.gmra.mxu1 %vm341_vm1, %v518_v17 }
 0x236   : > { %1316 = vmatpush3.xpose.msk.msra.mxu1 %vm341_vm1, %v702_v21  ;;  %1317 = vmatprep.mubr.msk.f32.mxu1 %vm1532_vm0, %v1531_v0 }
 0x237   : > { %1325 = vmatprep.subr.mxu1 %v1531_v0 }
 0x239   : > { %1318 = vmatmul.mubr.msk.f32.vlgmr.msra.gmra.mxu1 %vm341_vm1, %v699_v19 }
 0x23a   : > { %1326 = vmatpush3.xpose.msk.msra.mxu1 %vm341_vm1, %v883_v22  ;;  %1327 = vmatprep.mubr.msk.f32.mxu1 %vm1532_vm0, %v1531_v0 }
 0x23d   : > { %1328 = vmatmul.mubr.msk.f32.vlgmr.msra.gmra.mxu1 %vm341_vm1, %v880_v23 }
 0x2f1   : > { %v509_v24 = vpop.f32.mrf.mxu1 }
 0x2f2   : > { %513 = vst.msk [vmem:[%s1729_s15] sm:$0xff] %vm341_vm1, %v509_v24 }
 0x2f3   : > { %v1304_v25 = vpop.f32.mrf.mxu1 }
 0x2f5   : > { %v592_v26 = vpop.f32.mrf.mxu1 }
 0x2f6   : > { %v596_v27 = vmul.f32 0.17677669, %v592_v26 }
 0x2f7   : > { %v1309_v28 = vpop.f32.mrf.mxu1 }
 0x2f8   : > { %v597_v29 = vadd.f32 %v1686_v4, %v596_v27 }
 0x2f9   : > { %v773_v30 = vpop.f32.mrf.mxu1 }
 0x2fa   : > { %v777_v31 = vmul.f32 0.17677669, %v773_v30  ;;  %v598_v32 = vsel %vm426_vm2, %v597_v29, -inf }
 0x2fb   : > { %599 = vmax.xlane.f32.xlu1 %v598_v32  ;;  %v1319_v33 = vpop.f32.mrf.mxu1 }
 0x2fc   : > { %v778_v34 = vadd.f32 %v1686_v4, %v777_v31 }
 0x2fd   : > { %v954_v35 = vpop.f32.mrf.mxu1 }
 0x2fe   : > { %v958_v36 = vmul.f32 0.17677669, %v954_v35  ;;  %v779_v37 = vsel %vm426_vm2, %v778_v34, -inf }
 0x2ff   : > { %780 = vmax.xlane.f32.xlu0 %v779_v37  ;;  %v1329_v38 = vpop.f32.mrf.mxu1 }
 0x300   : > { %v959_v39 = vadd.f32 %v1686_v4, %v958_v36 }
 0x302   : > { %v960_v40 = vsel %vm426_vm2, %v959_v39, -inf }
 0x303   : > { %961 = vmax.xlane.f32.xlu1 %v960_v40 }
 0x384   : > { %v600_v41 = vpop.xlane.xlu1 %599 }
 0x385   : > { %v601_v42 = vsub.f32 %v597_v29, %v600_v41 }
 0x387   : > { %v602_v43 = vmul.f32 1.442695, %v601_v42 }
 0x388   : > { %v781_v44 = vpop.xlane.xlu0 %780 }
 0x389   : > { %1408 = vpow2.f32 %v602_v43  ;;  %v782_v45 = vsub.f32 %v778_v34, %v781_v44 }
 0x38b   : > { %v783_v46 = vmul.f32 1.442695, %v782_v45 }
 0x38c   : > { %v962_v51 = vpop.xlane.xlu1 %961 }
 0x38d   : > { %1410 = vpow2.f32 %v783_v46  ;;  %v963_v52 = vsub.f32 %v959_v39, %v962_v51 }
 0x38f   : > { %v964_v53 = vmul.f32 1.442695, %v963_v52 }
 0x391   : > { %1412 = vpow2.f32 %v964_v53 }
 0x396   : > { %v1409_v47 = vpop.eup %1408 }
 0x397   : > { %v604_v48 = vsel %vm426_vm2, %v1409_v47, 0.0 }
 0x398   : > { %605 = vadd.xlane.f32.xlu1 %v604_v48 }
 0x39a   : > { %v1411_v49 = vpop.eup %1410 }
 0x39b   : > { %v785_v50 = vsel %vm426_vm2, %v1411_v49, 0.0 }
 0x39c   : > { %786 = vadd.xlane.f32.xlu0 %v785_v50 }
 0x39e   : > { %v1413_v54 = vpop.eup %1412 }
 0x39f   : > { %v966_v55 = vsel %vm426_vm2, %v1413_v54, 0.0 }
 0x3a9   : > { %794 = vrot.lane.b32.xlu1 %v1700_v14, %s1534_s25 }
 0x3b2   : > { %613 = vrot.lane.b32.xlu0 %v1700_v14, %s1533_s24 }
 0x3cd   : > { %967 = vadd.xlane.f32.xlu1 %v966_v55 }
 0x3de   : > { %975 = vrot.lane.b32.xlu1 %v1700_v14, %s1535_s27 }
 0x421   : > { %v606_v56 = vpop.xlane.xlu1 %605 }
 0x422   : > { %1414 = vrcp.f32 %v606_v56 }
 0x425   : > { %v787_v57 = vpop.xlane.xlu0 %786  ;;  %v795_v61 = vpop.permute.xlu1 %794 }
 0x426   : > { %1416 = vrcp.f32 %v787_v57 }
 0x429   : > { %v614_v58 = vpop.permute.xlu0 %613 }
 0x42a   : > { %1311 = vmatpush3.msra.mxu0 %v614_v58 }
 0x42b   : > { %1320 = vmatprep.subr.mxu0 %v1531_v0 }
 0x42f   : > { %v1415_v59 = vpop.eup %1414 }
 0x430   : > { %v608_v60 = vmul.f32 %v1415_v59, %v1409_v47 }
 0x432   : > { %1258 = vst.msk [vmem:[%s1706_s30 + $0x8] sm:$0xff] %vm426_vm2, %v608_v60  ;;  %1313 = vmatmul.mubr.msk.f32.vlgmr.msra.gmra.mxu0 %vm426_vm2, %v608_v60 }
 0x433   : > { %v1417_v62 = vpop.eup %1416  ;;  %1321 = vmatpush3.msra.mxu0 %v795_v61  ;;  %1322 = vmatprep.mubr.msk.f32.mxu0 %vm1532_vm0, %v1531_v0 }
 0x434   : > { %v789_v63 = vmul.f32 %v1417_v62, %v1411_v49  ;;  %1330 = vmatprep.subr.mxu0 %v1531_v0 }
 0x436   : > { %1264 = vst.msk [vmem:[%s1706_s30 + $0x10] sm:$0xff] %vm426_vm2, %v789_v63  ;;  %1323 = vmatmul.mubr.msk.f32.vlgmr.msra.gmra.mxu0 %vm426_vm2, %v789_v63 }
 0x437   : > { %1332 = vmatprep.mubr.msk.f32.mxu0 %vm1532_vm0, %v1531_v0 }
 0x456   : > { %v968_v1 = vpop.xlane.xlu1 %967 }
 0x457   : > { %1418 = vrcp.f32 %v968_v1 }
 0x45a   : > { %v976_v2 = vpop.permute.xlu1 %975 }
 0x45b   : > { %1331 = vmatpush3.msra.mxu0 %v976_v2 }
 0x464   : > { %v1419_v3 = vpop.eup %1418 }
 0x465   : > { %v970_v4 = vmul.f32 %v1419_v3, %v1413_v54 }
 0x467   : > { %1270 = vst.msk [vmem:[%s1706_s30 + $0x18] sm:$0xff] %vm426_vm2, %v970_v4  ;;  %1333 = vmatmul.mubr.msk.f32.vlgmr.msra.gmra.mxu0 %vm426_vm2, %v970_v4 }
 0x4f2   : > { %v685_v5 = vpop.f32.mrf.mxu0 }
 0x4f3   : > { %690 = vrot.lane.b32.xlu0 %v685_v5, %s1535_s27 }
 0x4f4   : > { %v1314_v6 = vpop.f32.mrf.mxu0 }
 0x4f6   : > { %v866_v7 = vpop.f32.mrf.mxu0 }
 0x4f7   : > { %871 = vrot.lane.b32.xlu1 %v866_v7, %s1534_s25  ;;  %s1536_s25 = smov [#allocation5]  }
 0x4f8   : > { %v1324_v0 = vpop.f32.mrf.mxu0  ;;  %s1452_s27 = sshll.u32 %s1536_s25, 4  ;;  %s1453_s27 = int_to_ptr.vmem [resolvable:$false] %s1452_s27 }
 0x4f9   : > { %s1454_s21 = scalar_lea.vmem %s1453_s27, 1024  ;;  %p1455_p1 = scmp.lt.s32.totalorder %s1772_s16, %s1453_s27 }
 0x4fa   : > { %p1456_p2 = scmp.lt.s32.totalorder %s1454_s21, %s1448_s11 }
 0x4fc   : > { %p1457_p3 = por %p1456_p2, %p1455_p1 }
 0x4fe   : > { %p1458_p5 = pnand %p1457_p3, %p1451_p0 }
 0x500   : > { %1461 = shalt.err (!%p1458_p5)
}
 0x501   : > { %s1462_s30 = scalar_lea.hbm %s1770_s9, 512  ;;  %s1466_s12 = scalar_lea.hbm %s1828_s4, 1024 }
 0x502   : > { %p1463_p6 = scmp.ne.s32.totalorder %s1770_s9, %s1462_s30  ;;  %p1467_p4 = scmp.lt.s32.totalorder %s1770_s9, %s1828_s4 }
 0x503   : > { %p1468_p13 = scmp.lt.s32.totalorder %s1466_s12, %s1462_s30 }
 0x504   : > { %p1464_p7 = pnand %p1463_p6, %p1620_p9 }
 0x505   : > { %p1469_p12 = por %p1468_p13, %p1467_p4 }
 0x506   : > { %p1465_p10 = pneg %p1464_p7 }
 0x508   : > { %p1470_p8 = pnand %p1469_p12, %p1465_p10 }
 0x50a   : > { %1473 = shalt.err (!%p1470_p8)
}
 0x50b   : > { %s1537_s11 = smov 128   ;;  %s1538_s25 = smov 8   ;;  %vm693_vm3 = vcmask 523520   ;;  %vm874_vm4 = vcmask 785920   ;;  %vm1055_vm5 = vcmask 1048320  }
 0x50c   : > { %1337 = dma.vmem_to_hbm [thread:$0]  (%p1620_p9), %s1772_s16, 512, %s1770_s9, %s1058_s10, %s1537_s11, %s1537_s11, %s1538_s25  }
 0x527   : > { %v1047_v8 = vpop.f32.mrf.mxu0 }
 0x528   : > { %1052 = vrot.lane.b32.xlu0 %v1047_v8, %s1533_s24 }
 0x529   : > { %v1334_v9 = vpop.f32.mrf.mxu0 }
 0x565   : > { %v691_v10 = vpop.permute.xlu0 %690 }
 0x566   : > { %694 = vst.msk [vmem:[%s1729_s15] sm:$0xff] %vm693_vm3, %v691_v10 }
 0x569   : > { %v872_v11 = vpop.permute.xlu1 %871 }
 0x56a   : > { %875 = vst.msk [vmem:[%s1729_s15] sm:$0xff] %vm874_vm4, %v872_v11 }
 0x59a   : > { %v1053_v12 = vpop.permute.xlu0 %1052 }
 0x59b   : > { %1056 = vst.msk [vmem:[%s1729_s15] sm:$0xff] %vm1055_vm5, %v1053_v12 }
 0x59c PF: > { %s1097_s6 = sand.u32 1, %s1508_s18   ;;  %p1835_p11 = scmp.ne.s32.totalorder %s1833_s8, 0 }
 0x59d   : > { %p1836_p9 = scmp.ge.s32.totalorder %s1528_s23, 2  ;;  %s1098_s28 = scalar_lea.sflag [#allocation4], %s1097_s6 }
 0x59f   : > { %p1344_p0 = pnand %p1836_p9, %p1835_p11 }
 0x5a1   : > { %p1345_p1 = pneg %p1344_p0 }
 0x5a3   : > { %1503 = dma.done.wait (%p1345_p1), %s1098_s28, 512  }
 0x5a4   : > { %1505 = vsyncadd (%p1345_p1), %s1098_s28, 4294966784  ;;  %s22_s23 = sadd.s32 1, %s1528_s23   ;;  %s1837_s18 = smov %s1512_s19 }
 0x5a5   : > { %p19_p2 = scmp.ge.s32.totalorder %s22_s23, 4   ;;  %s1838_s19 = smov %s1516_s20 }
 0x5a6   : > { %s1839_s20 = smov %s1625_s7  ;;  %s1840_s21 = smov %s1524_s22 }
 0x5a7   : > { %s1841_s22 = smov %s1843_s26  ;;  %21 = sbr.rel (!%p19_p2) target bundleno = 6 (0x6), region = 105 }
 0x5ac   :  { %1113 = vsyncpa [#allocation3], 1 }
 0x5ad   :  { %1115 = vsyncpa [#allocation3 + $0x1], 1 }
 0x5ae   :  { %1116 = vsyncpa [#allocation4], 1 }
 0x5af   :  { %1118 = vsyncpa [#allocation4 + $0x1], 1 }

// kernel: bert_layer.8
= control target key start
LH: loop header
LB: loop body
LE: loop exit
PB: predicated region body
PF: predicated region fallthrough
CT: control target
= control target key end

     0   :  { %v325_v3 = vmov 0.0   ;;  %s575_s1 = inlined_call_operand.vmem [shape: f32[128,512], index: 1, kind: input, shape index: {}]   ;;  %s576_s0 = inlined_call_operand.vmem [shape: f32[16,128], index: 0, kind: input, shape index: {}]   ;;  %s577_s2 = inlined_call_operand.vmem [shape: f32[1,512], index: 2, kind: input, shape index: {}]   ;;  %s578_s3 = inlined_call_operand.vmem [shape: f32[16,512], index: 3, kind: output, shape index: {}]  }
   0x1   :  { %v77_v0 = vld [vmem:[%s575_s1 + $0x1e8] sm:$0xff]  ;;  %v79_v1 = vld [vmem:[%s575_s1 + $0x1f8] sm:$0xff]  ;;  %v76_v2 = vld [vmem:[%s575_s1 + $0x1e0] sm:$0xff]  ;;  %166 = vmatprep.mubr.f32.mxu0 %v325_v3  ;;  %243 = vmatprep.mubr.f32.mxu1 %v325_v3 }
   0x2   :  { %102 = vmatprep.subr.mxu0 %v77_v0  ;;  %179 = vmatprep.subr.mxu1 %v79_v1  ;;  %v78_v4 = vld [vmem:[%s575_s1 + $0x1f0] sm:$0xff]  ;;  %v73_v5 = vld [vmem:[%s575_s1 + $0x1c8] sm:$0xff]  ;;  %v75_v6 = vld [vmem:[%s575_s1 + $0x1d8] sm:$0xff] }
   0x3   :  { %103 = vmatpush1.msra.mxu0 %v76_v2  ;;  %180 = vmatpush1.msra.mxu1 %v78_v4  ;;  %v72_v7 = vld [vmem:[%s575_s1 + $0x1c0] sm:$0xff]  ;;  %v74_v8 = vld [vmem:[%s575_s1 + $0x1d0] sm:$0xff]  ;;  %v69_v9 = vld [vmem:[%s575_s1 + $0x1a8] sm:$0xff]  ;;  %v82_v4 = vlaneseq }
   0x4   :  { %104 = vmatprep.subr.mxu0 %v73_v5  ;;  %181 = vmatprep.subr.mxu1 %v75_v6  ;;  %v71_v10 = vld [vmem:[%s575_s1 + $0x1b8] sm:$0xff]  ;;  %v68_v11 = vld [vmem:[%s575_s1 + $0x1a0] sm:$0xff]  ;;  %v70_v12 = vld [vmem:[%s575_s1 + $0x1b0] sm:$0xff] }
   0x5   :  { %105 = vmatpush1.msra.mxu0 %v72_v7  ;;  %182 = vmatpush1.msra.mxu1 %v74_v8  ;;  %v65_v13 = vld [vmem:[%s575_s1 + $0x188] sm:$0xff]  ;;  %v67_v14 = vld [vmem:[%s575_s1 + $0x198] sm:$0xff]  ;;  %v64_v15 = vld [vmem:[%s575_s1 + $0x180] sm:$0xff]  ;;  %v83_v5 = vshrl.u32 %v82_v4, 7 }
   0x6   :  { %106 = vmatprep.subr.mxu0 %v69_v9  ;;  %183 = vmatprep.subr.mxu1 %v71_v10  ;;  %v66_v16 = vld [vmem:[%s575_s1 + $0x190] sm:$0xff]  ;;  %v61_v17 = vld [vmem:[%s575_s1 + $0x168] sm:$0xff]  ;;  %v63_v18 = vld [vmem:[%s575_s1 + $0x178] sm:$0xff] }
   0x7   :  { %107 = vmatpush1.msra.mxu0 %v68_v11  ;;  %184 = vmatpush1.msra.mxu1 %v70_v12  ;;  %v60_v19 = vld [vmem:[%s575_s1 + $0x160] sm:$0xff]  ;;  %v62_v20 = vld [vmem:[%s575_s1 + $0x170] sm:$0xff]  ;;  %v57_v21 = vld [vmem:[%s575_s1 + $0x148] sm:$0xff]  ;;  %v84_v6 = vsub.s32 0, %v83_v5  ;;  %v92_v7 = vsub.s32 2, %v83_v5  ;;  %v88_v9 = vsub.s32 1, %v83_v5 }
   0x8   :  { %108 = vmatprep.subr.mxu0 %v65_v13  ;;  %185 = vmatprep.subr.mxu1 %v67_v14  ;;  %v59_v22 = vld [vmem:[%s575_s1 + $0x158] sm:$0xff]  ;;  %v56_v23 = vld [vmem:[%s575_s1 + $0x140] sm:$0xff]  ;;  %v58_v24 = vld [vmem:[%s575_s1 + $0x150] sm:$0xff]  ;;  %v96_v10 = vsub.s32 3, %v83_v5 }
   0x9   :  { %109 = vmatpush1.msra.mxu0 %v64_v15  ;;  %186 = vmatpush1.msra.mxu1 %v66_v16  ;;  %v53_v25 = vld [vmem:[%s575_s1 + $0x128] sm:$0xff]  ;;  %v55_v26 = vld [vmem:[%s575_s1 + $0x138] sm:$0xff]  ;;  %v52_v27 = vld [vmem:[%s575_s1 + $0x120] sm:$0xff] }
   0xa   :  { %110 = vmatprep.subr.mxu0 %v61_v17  ;;  %187 = vmatprep.subr.mxu1 %v63_v18  ;;  %v54_v28 = vld [vmem:[%s575_s1 + $0x130] sm:$0xff]  ;;  %v49_v29 = vld [vmem:[%s575_s1 + $0x108] sm:$0xff]  ;;  %v51_v30 = vld [vmem:[%s575_s1 + $0x118] sm:$0xff] }
   0xb   :  { %111 = vmatpush1.msra.mxu0 %v60_v19  ;;  %188 = vmatpush1.msra.mxu1 %v62_v20  ;;  %v48_v31 = vld [vmem:[%s575_s1 + $0x100] sm:$0xff]  ;;  %v50_v32 = vld [vmem:[%s575_s1 + $0x110] sm:$0xff]  ;;  %v45_v33 = vld [vmem:[%s575_s1 + $0xe8] sm:$0xff] }
   0xc   :  { %112 = vmatprep.subr.mxu0 %v57_v21  ;;  %189 = vmatprep.subr.mxu1 %v59_v22  ;;  %v47_v34 = vld [vmem:[%s575_s1 + $0xf8] sm:$0xff]  ;;  %v44_v35 = vld [vmem:[%s575_s1 + $0xe0] sm:$0xff]  ;;  %v46_v36 = vld [vmem:[%s575_s1 + $0xf0] sm:$0xff] }
   0xd   :  { %113 = vmatpush1.msra.mxu0 %v56_v23  ;;  %190 = vmatpush1.msra.mxu1 %v58_v24  ;;  %v41_v37 = vld [vmem:[%s575_s1 + $0xc8] sm:$0xff]  ;;  %v43_v38 = vld [vmem:[%s575_s1 + $0xd8] sm:$0xff]  ;;  %v40_v39 = vld [vmem:[%s575_s1 + $0xc0] sm:$0xff] }
   0xe   :  { %114 = vmatprep.subr.mxu0 %v53_v25  ;;  %191 = vmatprep.subr.mxu1 %v55_v26  ;;  %v42_v40 = vld [vmem:[%s575_s1 + $0xd0] sm:$0xff]  ;;  %v37_v41 = vld [vmem:[%s575_s1 + $0xa8] sm:$0xff]  ;;  %v39_v42 = vld [vmem:[%s575_s1 + $0xb8] sm:$0xff] }
   0xf   :  { %115 = vmatpush1.msra.mxu0 %v52_v27  ;;  %192 = vmatpush1.msra.mxu1 %v54_v28  ;;  %v36_v43 = vld [vmem:[%s575_s1 + $0xa0] sm:$0xff]  ;;  %v38_v44 = vld [vmem:[%s575_s1 + $0xb0] sm:$0xff]  ;;  %v33_v45 = vld [vmem:[%s575_s1 + $0x88] sm:$0xff] }
  0x10   :  { %116 = vmatprep.subr.mxu0 %v49_v29  ;;  %193 = vmatprep.subr.mxu1 %v51_v30  ;;  %v35_v46 = vld [vmem:[%s575_s1 + $0x98] sm:$0xff]  ;;  %v32_v47 = vld [vmem:[%s575_s1 + $0x80] sm:$0xff]  ;;  %v34_v48 = vld [vmem:[%s575_s1 + $0x90] sm:$0xff] }
  0x11   :  { %117 = vmatpush1.msra.mxu0 %v48_v31  ;;  %194 = vmatpush1.msra.mxu1 %v50_v32  ;;  %v29_v49 = vld [vmem:[%s575_s1 + $0x68] sm:$0xff]  ;;  %v31_v50 = vld [vmem:[%s575_s1 + $0x78] sm:$0xff]  ;;  %v28_v51 = vld [vmem:[%s575_s1 + $0x60] sm:$0xff] }
  0x12   :  { %118 = vmatprep.subr.mxu0 %v45_v33  ;;  %195 = vmatprep.subr.mxu1 %v47_v34  ;;  %v30_v52 = vld [vmem:[%s575_s1 + $0x70] sm:$0xff]  ;;  %v25_v53 = vld [vmem:[%s575_s1 + $0x48] sm:$0xff]  ;;  %v27_v54 = vld [vmem:[%s575_s1 + $0x58] sm:$0xff] }
  0x13   :  { %119 = vmatpush1.msra.mxu0 %v44_v35  ;;  %196 = vmatpush1.msra.mxu1 %v46_v36  ;;  %v24_v55 = vld [vmem:[%s575_s1 + $0x40] sm:$0xff]  ;;  %v26_v56 = vld [vmem:[%s575_s1 + $0x50] sm:$0xff]  ;;  %v21_v57 = vld [vmem:[%s575_s1 + $0x28] sm:$0xff] }
  0x14   :  { %120 = vmatprep.subr.mxu0 %v41_v37  ;;  %197 = vmatprep.subr.mxu1 %v43_v38  ;;  %v23_v58 = vld [vmem:[%s575_s1 + $0x38] sm:$0xff]  ;;  %v20_v59 = vld [vmem:[%s575_s1 + $0x20] sm:$0xff]  ;;  %v22_v60 = vld [vmem:[%s575_s1 + $0x30] sm:$0xff] }
  0x15   :  { %121 = vmatpush1.msra.mxu0 %v40_v39  ;;  %198 = vmatpush1.msra.mxu1 %v42_v40  ;;  %v17_v61 = vld [vmem:[%s575_s1 + $0x8] sm:$0xff]  ;;  %v19_v62 = vld [vmem:[%s575_s1 + $0x18] sm:$0xff]  ;;  %v16_v63 = vld [vmem:[%s575_s1] sm:$0xff] }
  0x16   :  { %122 = vmatprep.subr.mxu0 %v37_v41  ;;  %199 = vmatprep.subr.mxu1 %v39_v42  ;;  %v18_v0 = vld [vmem:[%s575_s1 + $0x10] sm:$0xff]  ;;  %v14_v1 = vld [vmem:[%s576_s0] sm:$0xff]  ;;  %v15_v2 = vld [vmem:[%s576_s0 + $0x8] sm:$0xff] }
  0x17   :  { %123 = vmatpush1.msra.mxu0 %v36_v43  ;;  %200 = vmatpush1.msra.mxu1 %v38_v44  ;;  %v80_v8 = vld [vmem:[%s577_s2] sm:$0xf] }
  0x18   :  { %124 = vmatprep.subr.mxu0 %v33_v45  ;;  %201 = vmatprep.subr.mxu1 %v35_v46  ;;  %v85_v11 = vrot.slane %v80_v8, %v84_v6  ;;  %v93_v12 = vrot.slane %v80_v8, %v92_v7  ;;  %v89_v14 = vrot.slane %v80_v8, %v88_v9 }
  0x19   :  { %125 = vmatpush1.msra.mxu0 %v32_v47  ;;  %202 = vmatpush1.msra.mxu1 %v34_v48  ;;  %v97_v15 = vrot.slane %v80_v8, %v96_v10 }
  0x1a   :  { %126 = vmatprep.subr.mxu0 %v29_v49  ;;  %203 = vmatprep.subr.mxu1 %v31_v50 }
  0x1b   :  { %127 = vmatpush1.msra.mxu0 %v28_v51  ;;  %204 = vmatpush1.msra.mxu1 %v30_v52 }
  0x1c   :  { %128 = vmatprep.subr.mxu0 %v25_v53  ;;  %205 = vmatprep.subr.mxu1 %v27_v54 }
  0x1d   :  { %129 = vmatpush1.msra.mxu0 %v24_v55  ;;  %206 = vmatpush1.msra.mxu1 %v26_v56 }
  0x1e   :  { %130 = vmatprep.subr.mxu0 %v21_v57  ;;  %207 = vmatprep.subr.mxu1 %v23_v58 }
  0x1f   :  { %131 = vmatpush1.msra.mxu0 %v20_v59  ;;  %208 = vmatpush1.msra.mxu1 %v22_v60 }
  0x20   :  { %132 = vmatprep.subr.mxu0 %v17_v61  ;;  %209 = vmatprep.subr.mxu1 %v19_v62 }
  0x21   :  { %133 = vmatpush1.msra.mxu0 %v16_v63  ;;  %210 = vmatpush1.msra.mxu1 %v18_v0 }
  0x22   :  { %167 = vmatmul.mubr.f32.vlgmr.msra.gmra.mxu0 %v14_v1  ;;  %244 = vmatmul.mubr.f32.vlgmr.msra.gmra.mxu1 %v14_v1 }
  0x23   :  { %172 = vmatprep.mubr.f32.mxu0 %v325_v3  ;;  %249 = vmatprep.mubr.f32.mxu1 %v325_v3 }
  0x26   :  { %173 = vmatmul.mubr.f32.gmra.mxu0 %v15_v2  ;;  %250 = vmatmul.mubr.f32.gmra.mxu1 %v15_v2 }
  0xe2   :  { %v168_v13 = vpop.f32.mrf.mxu0  ;;  %v245_v3 = vpop.f32.mrf.mxu1 }
  0xe3   :  { %v169_v16 = vadd.f32 %v168_v13, %v85_v11  ;;  %v246_v17 = vadd.f32 %v245_v3, %v93_v12 }
  0xe4   :  { %v170_v18 = vpop.f32.mrf.mxu0  ;;  %v247_v19 = vpop.f32.mrf.mxu1 }
  0xe5   :  { %v264_v20 = vmul.f32 0.70710677, %v169_v16  ;;  %v266_v21 = vmul.f32 0.70710677, %v246_v17  ;;  %v171_v22 = vadd.f32 %v170_v18, %v89_v14  ;;  %v248_v23 = vadd.f32 %v247_v19, %v97_v15 }
  0xe6   :  { %v174_v24 = vpop.f32.mrf.mxu0  ;;  %v251_v25 = vpop.f32.mrf.mxu1  ;;  %v256_v40 = vmul.f32 0.5, %v169_v16  ;;  %v258_v42 = vmul.f32 0.5, %v246_v17 }
  0xe7   :  { %309 = verf.f32 %v264_v20  ;;  %v175_v26 = vadd.f32 %v174_v24, %v85_v11  ;;  %v252_v27 = vadd.f32 %v251_v25, %v93_v12  ;;  %v265_v28 = vmul.f32 0.70710677, %v171_v22 }
  0xe8   :  { %311 = verf.f32 %v266_v21  ;;  %v176_v29 = vpop.f32.mrf.mxu0  ;;  %v253_v30 = vpop.f32.mrf.mxu1  ;;  %v267_v31 = vmul.f32 0.70710677, %v248_v23  ;;  %v257_v48 = vmul.f32 0.5, %v171_v22  ;;  %v259_v51 = vmul.f32 0.5, %v248_v23 }
  0xe9   :  { %v268_v32 = vmul.f32 0.70710677, %v175_v26  ;;  %313 = verf.f32 %v265_v28  ;;  %v270_v33 = vmul.f32 0.70710677, %v252_v27  ;;  %v177_v34 = vadd.f32 %v176_v29, %v89_v14 }
  0xea   :  { %v254_v35 = vadd.f32 %v253_v30, %v97_v15  ;;  %315 = verf.f32 %v267_v31  ;;  %v260_v55 = vmul.f32 0.5, %v175_v26  ;;  %v262_v59 = vmul.f32 0.5, %v252_v27 }
  0xeb   :  { %317 = verf.f32 %v268_v32  ;;  %v269_v36 = vmul.f32 0.70710677, %v177_v34  ;;  %v261_v63 = vmul.f32 0.5, %v177_v34 }
  0xec   :  { %319 = verf.f32 %v270_v33  ;;  %v271_v37 = vmul.f32 0.70710677, %v254_v35  ;;  %v263_v2 = vmul.f32 0.5, %v254_v35 }
  0xed   :  { %321 = verf.f32 %v269_v36 }
  0xee   :  { %323 = verf.f32 %v271_v37 }
  0xf4   :  { %v310_v38 = vpop.eup %309 }
  0xf5   :  { %v312_v39 = vpop.eup %311  ;;  %v280_v41 = vadd.f32 1.0, %v310_v38 }
  0xf6   :  { %v282_v43 = vadd.f32 1.0, %v312_v39  ;;  %v314_v44 = vpop.eup %313 }
  0xf7   :  { %v288_v45 = vmul.f32 %v280_v41, %v256_v40  ;;  %v316_v46 = vpop.eup %315  ;;  %v281_v49 = vadd.f32 1.0, %v314_v44 }
  0xf8   :  { %v290_v47 = vmul.f32 %v282_v43, %v258_v42  ;;  %v318_v50 = vpop.eup %317  ;;  %v283_v52 = vadd.f32 1.0, %v316_v46 }
  0xf9   :  { %296 = vst [vmem:[%s578_s3] sm:$0xff] %v288_v45  ;;  %v320_v53 = vpop.eup %319  ;;  %v289_v54 = vmul.f32 %v281_v49, %v257_v48  ;;  %v284_v56 = vadd.f32 1.0, %v318_v50 }
  0xfa   :  { %298 = vst [vmem:[%s578_s3 + $0x10] sm:$0xff] %v290_v47  ;;  %v322_v57 = vpop.eup %321  ;;  %v291_v58 = vmul.f32 %v283_v52, %v259_v51  ;;  %v286_v60 = vadd.f32 1.0, %v320_v53 }
  0xfb   :  { %v324_v61 = vpop.eup %323  ;;  %297 = vst [vmem:[%s578_s3 + $0x8] sm:$0xff] %v289_v54  ;;  %v292_v62 = vmul.f32 %v284_v56, %v260_v55  ;;  %v285_v0 = vadd.f32 1.0, %v322_v57 }
  0xfc   :  { %299 = vst [vmem:[%s578_s3 + $0x18] sm:$0xff] %v291_v58  ;;  %v294_v1 = vmul.f32 %v286_v60, %v262_v59  ;;  %v287_v4 = vadd.f32 1.0, %v324_v61 }
  0xfd   :  { %300 = vst [vmem:[%s578_s3 + $0x20] sm:$0xff] %v292_v62  ;;  %v293_v5 = vmul.f32 %v285_v0, %v261_v63 }
  0xfe   :  { %302 = vst [vmem:[%s578_s3 + $0x30] sm:$0xff] %v294_v1  ;;  %v295_v6 = vmul.f32 %v287_v4, %v263_v2 }
  0xff   :  { %301 = vst [vmem:[%s578_s3 + $0x28] sm:$0xff] %v293_v5 }
 0x100   :  { %303 = vst [vmem:[%s578_s3 + $0x38] sm:$0xff] %v295_v6 }

// kernel: bert_layer.9
= control target key start
LH: loop header
LB: loop body
LE: loop exit
PB: predicated region body
PF: predicated region fallthrough
CT: control target
= control target key end

     0   :  { %s696_s0 = inlined_call_operand.vmem [shape: f32[16,512], index: 0, kind: input, shape index: {}]   ;;  %s697_s1 = inlined_call_operand.vmem [shape: f32[512,128], index: 1, kind: input, shape index: {}]   ;;  %s698_s2 = inlined_call_operand.vmem [shape: f32[1,128], index: 2, kind: input, shape index: {}]   ;;  %s699_s3 = inlined_call_operand.vmem [shape: f32[16,128], index: 3, kind: input, shape index: {}]   ;;  %s700_s4 = inlined_call_operand.vmem [shape: f32[1,128], index: 4, kind: input, shape index: {}]   ;;  %s701_s5 = inlined_call_operand.vmem [shape: f32[1,128], index: 5, kind: input, shape index: {}]   ;;  %s702_s6 = inlined_call_operand.hbm [shape: f32[16,128], index: 6, kind: output, shape index: {}]  }
   0x1   :  { %v63_v0 = vld [vmem:[%s697_s1 + $0xf8] sm:$0xff]  ;;  %v62_v4 = vld [vmem:[%s697_s1 + $0xf0] sm:$0xff]  ;;  %v61_v8 = vld [vmem:[%s697_s1 + $0xe8] sm:$0xff] }
   0x2   :  { %v95_v1 = vld [vmem:[%s697_s1 + $0x1f8] sm:$0xff]  ;;  %319 = vmatprep.subr.mxu0 %v63_v0  ;;  %v94_v5 = vld [vmem:[%s697_s1 + $0x1f0] sm:$0xff]  ;;  %v93_v9 = vld [vmem:[%s697_s1 + $0x1e8] sm:$0xff] }
   0x3   :  { %v47_v2 = vld [vmem:[%s697_s1 + $0x78] sm:$0xff]  ;;  %357 = vmatprep.subr.mxu1 %v95_v1  ;;  %v46_v6 = vld [vmem:[%s697_s1 + $0x70] sm:$0xff]  ;;  %v45_v10 = vld [vmem:[%s697_s1 + $0x68] sm:$0xff] }
   0x4   :  { %v79_v3 = vld [vmem:[%s697_s1 + $0x178] sm:$0xff]  ;;  %320 = vmatpush3.msra.mxu0 %v47_v2  ;;  %v78_v7 = vld [vmem:[%s697_s1 + $0x170] sm:$0xff]  ;;  %v77_v11 = vld [vmem:[%s697_s1 + $0x168] sm:$0xff] }
   0x5   :  { %358 = vmatpush3.msra.mxu1 %v79_v3  ;;  %321 = vmatprep.subr.mxu0 %v62_v4  ;;  %v60_v12 = vld [vmem:[%s697_s1 + $0xe0] sm:$0xff]  ;;  %v59_v16 = vld [vmem:[%s697_s1 + $0xd8] sm:$0xff]  ;;  %v58_v20 = vld [vmem:[%s697_s1 + $0xd0] sm:$0xff] }
   0x6   :  { %359 = vmatprep.subr.mxu1 %v94_v5  ;;  %322 = vmatpush3.msra.mxu0 %v46_v6  ;;  %v92_v13 = vld [vmem:[%s697_s1 + $0x1e0] sm:$0xff]  ;;  %v91_v17 = vld [vmem:[%s697_s1 + $0x1d8] sm:$0xff]  ;;  %v90_v21 = vld [vmem:[%s697_s1 + $0x1d0] sm:$0xff] }
   0x7   :  { %360 = vmatpush3.msra.mxu1 %v78_v7  ;;  %323 = vmatprep.subr.mxu0 %v61_v8  ;;  %v44_v14 = vld [vmem:[%s697_s1 + $0x60] sm:$0xff]  ;;  %v43_v18 = vld [vmem:[%s697_s1 + $0x58] sm:$0xff]  ;;  %v42_v22 = vld [vmem:[%s697_s1 + $0x50] sm:$0xff] }
   0x8   :  { %361 = vmatprep.subr.mxu1 %v93_v9  ;;  %v76_v15 = vld [vmem:[%s697_s1 + $0x160] sm:$0xff]  ;;  %324 = vmatpush3.msra.mxu0 %v45_v10  ;;  %v75_v19 = vld [vmem:[%s697_s1 + $0x158] sm:$0xff]  ;;  %v74_v23 = vld [vmem:[%s697_s1 + $0x150] sm:$0xff] }
   0x9   :  { %362 = vmatpush3.msra.mxu1 %v77_v11  ;;  %325 = vmatprep.subr.mxu0 %v60_v12  ;;  %v57_v24 = vld [vmem:[%s697_s1 + $0xc8] sm:$0xff]  ;;  %v56_v28 = vld [vmem:[%s697_s1 + $0xc0] sm:$0xff]  ;;  %v55_v32 = vld [vmem:[%s697_s1 + $0xb8] sm:$0xff] }
   0xa   :  { %363 = vmatprep.subr.mxu1 %v92_v13  ;;  %326 = vmatpush3.msra.mxu0 %v44_v14  ;;  %v89_v25 = vld [vmem:[%s697_s1 + $0x1c8] sm:$0xff]  ;;  %v88_v29 = vld [vmem:[%s697_s1 + $0x1c0] sm:$0xff]  ;;  %v87_v33 = vld [vmem:[%s697_s1 + $0x1b8] sm:$0xff] }
   0xb   :  { %364 = vmatpush3.msra.mxu1 %v76_v15  ;;  %327 = vmatprep.subr.mxu0 %v59_v16  ;;  %v41_v26 = vld [vmem:[%s697_s1 + $0x48] sm:$0xff]  ;;  %v40_v30 = vld [vmem:[%s697_s1 + $0x40] sm:$0xff]  ;;  %v39_v34 = vld [vmem:[%s697_s1 + $0x38] sm:$0xff] }
   0xc   :  { %365 = vmatprep.subr.mxu1 %v91_v17  ;;  %328 = vmatpush3.msra.mxu0 %v43_v18  ;;  %v73_v27 = vld [vmem:[%s697_s1 + $0x148] sm:$0xff]  ;;  %v72_v31 = vld [vmem:[%s697_s1 + $0x140] sm:$0xff]  ;;  %v71_v35 = vld [vmem:[%s697_s1 + $0x138] sm:$0xff] }
   0xd   :  { %366 = vmatpush3.msra.mxu1 %v75_v19  ;;  %329 = vmatprep.subr.mxu0 %v58_v20  ;;  %v54_v36 = vld [vmem:[%s697_s1 + $0xb0] sm:$0xff]  ;;  %v53_v40 = vld [vmem:[%s697_s1 + $0xa8] sm:$0xff]  ;;  %v52_v44 = vld [vmem:[%s697_s1 + $0xa0] sm:$0xff] }
   0xe   :  { %367 = vmatprep.subr.mxu1 %v90_v21  ;;  %330 = vmatpush3.msra.mxu0 %v42_v22  ;;  %v86_v37 = vld [vmem:[%s697_s1 + $0x1b0] sm:$0xff]  ;;  %v85_v41 = vld [vmem:[%s697_s1 + $0x1a8] sm:$0xff]  ;;  %v84_v45 = vld [vmem:[%s697_s1 + $0x1a0] sm:$0xff] }
   0xf   :  { %368 = vmatpush3.msra.mxu1 %v74_v23  ;;  %331 = vmatprep.subr.mxu0 %v57_v24  ;;  %v38_v38 = vld [vmem:[%s697_s1 + $0x30] sm:$0xff]  ;;  %v37_v42 = vld [vmem:[%s697_s1 + $0x28] sm:$0xff]  ;;  %v36_v46 = vld [vmem:[%s697_s1 + $0x20] sm:$0xff] }
  0x10   :  { %369 = vmatprep.subr.mxu1 %v89_v25  ;;  %332 = vmatpush3.msra.mxu0 %v41_v26  ;;  %v70_v39 = vld [vmem:[%s697_s1 + $0x130] sm:$0xff]  ;;  %v69_v43 = vld [vmem:[%s697_s1 + $0x128] sm:$0xff]  ;;  %v68_v47 = vld [vmem:[%s697_s1 + $0x120] sm:$0xff] }
  0x11   :  { %370 = vmatpush3.msra.mxu1 %v73_v27  ;;  %333 = vmatprep.subr.mxu0 %v56_v28  ;;  %v51_v48 = vld [vmem:[%s697_s1 + $0x98] sm:$0xff]  ;;  %v50_v52 = vld [vmem:[%s697_s1 + $0x90] sm:$0xff] }
  0x12   :  { %371 = vmatprep.subr.mxu1 %v88_v29  ;;  %334 = vmatpush3.msra.mxu0 %v40_v30  ;;  %v83_v49 = vld [vmem:[%s697_s1 + $0x198] sm:$0xff]  ;;  %v82_v53 = vld [vmem:[%s697_s1 + $0x190] sm:$0xff] }
  0x13   :  { %372 = vmatpush3.msra.mxu1 %v72_v31  ;;  %335 = vmatprep.subr.mxu0 %v55_v32  ;;  %v35_v50 = vld [vmem:[%s697_s1 + $0x18] sm:$0xff] }
  0x14   :  { %373 = vmatprep.subr.mxu1 %v87_v33  ;;  %336 = vmatpush3.msra.mxu0 %v39_v34  ;;  %v67_v51 = vld [vmem:[%s697_s1 + $0x118] sm:$0xff] }
  0x15   :  { %374 = vmatpush3.msra.mxu1 %v71_v35  ;;  %337 = vmatprep.subr.mxu0 %v54_v36 }
  0x16   :  { %375 = vmatprep.subr.mxu1 %v86_v37  ;;  %338 = vmatpush3.msra.mxu0 %v38_v38 }
  0x17   :  { %376 = vmatpush3.msra.mxu1 %v70_v39  ;;  %339 = vmatprep.subr.mxu0 %v53_v40 }
  0x18   :  { %377 = vmatprep.subr.mxu1 %v85_v41  ;;  %340 = vmatpush3.msra.mxu0 %v37_v42 }
  0x19   :  { %378 = vmatpush3.msra.mxu1 %v69_v43  ;;  %341 = vmatprep.subr.mxu0 %v52_v44 }
  0x1a   :  { %379 = vmatprep.subr.mxu1 %v84_v45  ;;  %342 = vmatpush3.msra.mxu0 %v36_v46 }
  0x1b   :  { %380 = vmatpush3.msra.mxu1 %v68_v47 }
  0x1c   :  { %11 = vsyncpa [#allocation3], 0  ;;  %343 = vmatprep.subr.mxu0 %v51_v48  ;;  %381 = vmatprep.subr.mxu1 %v83_v49  ;;  %v34_v54 = vld [vmem:[%s697_s1 + $0x10] sm:$0xff]  ;;  %v49_v56 = vld [vmem:[%s697_s1 + $0x88] sm:$0xff]  ;;  %s424_s27 = smov [#allocation2]  }
  0x1d   :  { %v66_v55 = vld [vmem:[%s697_s1 + $0x110] sm:$0xff]  ;;  %344 = vmatpush3.msra.mxu0 %v35_v50  ;;  %382 = vmatpush3.msra.mxu1 %v67_v51  ;;  %v81_v57 = vld [vmem:[%s697_s1 + $0x188] sm:$0xff]  ;;  %v48_v60 = vld [vmem:[%s697_s1 + $0x80] sm:$0xff]  ;;  %s305_s28 = sshll.u32 %s424_s27, 4  ;;  %s306_s28 = int_to_ptr.vmem [resolvable:$true] %s305_s28 }
  0x1e   :  { %345 = vmatprep.subr.mxu0 %v50_v52  ;;  %383 = vmatprep.subr.mxu1 %v82_v53  ;;  %v33_v58 = vld [vmem:[%s697_s1 + $0x8] sm:$0xff]  ;;  %v80_v61 = vld [vmem:[%s697_s1 + $0x180] sm:$0xff]  ;;  %v27_v1 = vld [vmem:[%s696_s0 + $0x18] sm:$0xff]  ;;  %s402_s29 = scalar_lea.vmem %s306_s28, 256  ;;  %p407_p1 = scmp.lt.s32.totalorder %s306_s28, %s306_s28 }
  0x1f   :  { %v65_v59 = vld [vmem:[%s697_s1 + $0x108] sm:$0xff]  ;;  %346 = vmatpush3.msra.mxu0 %v34_v54  ;;  %384 = vmatpush3.msra.mxu1 %v66_v55  ;;  %v32_v62 = vld [vmem:[%s697_s1] sm:$0xff]  ;;  %v26_v3 = vld [vmem:[%s696_s0 + $0x10] sm:$0xff]  ;;  %p403_p0 = scmp.ne.s32.totalorder %s306_s28, %s402_s29  ;;  %p408_p2 = scmp.lt.s32.totalorder %s402_s29, %s402_s29 }
  0x20   :  { %347 = vmatprep.subr.mxu0 %v49_v56  ;;  %385 = vmatprep.subr.mxu1 %v81_v57  ;;  %v25_v63 = vld [vmem:[%s696_s0 + $0x8] sm:$0xff]  ;;  %v64_v0 = vld [vmem:[%s697_s1 + $0x100] sm:$0xff]  ;;  %v31_v5 = vld [vmem:[%s696_s0 + $0x38] sm:$0xff] }
  0x21   :  { %348 = vmatpush3.msra.mxu0 %v33_v58  ;;  %386 = vmatpush3.msra.mxu1 %v65_v59  ;;  %v24_v2 = vld [vmem:[%s696_s0] sm:$0xff]  ;;  %v29_v4 = vld [vmem:[%s696_s0 + $0x28] sm:$0xff]  ;;  %v30_v7 = vld [vmem:[%s696_s0 + $0x30] sm:$0xff]  ;;  %p409_p3 = por %p408_p2, %p407_p1 }
  0x22   :  { %349 = vmatprep.subr.mxu0 %v48_v60  ;;  %387 = vmatprep.subr.mxu1 %v80_v61  ;;  %v28_v6 = vld [vmem:[%s696_s0 + $0x20] sm:$0xff]  ;;  %v254_v26 = vld [vmem:[%s699_s3 + $0x8] sm:$0xff] }
  0x23   :  { %350 = vmatpush3.msra.mxu0 %v32_v62  ;;  %167 = vmatprep.mubr.f32.mxu0 %v25_v63  ;;  %v316_v10 = vld [vmem:[%s698_s2] ss:$0 sm:$0xff]  ;;  %p410_p4 = pnand %p409_p3, %p403_p0 }
  0x24   :  { %388 = vmatpush3.msra.mxu1 %v64_v0  ;;  %242 = vmatprep.mubr.f32.mxu1 %v27_v1  ;;  %v253_v20 = vld [vmem:[%s699_s3] sm:$0xff] }
  0x25   :  { %168 = vmatmul.mubr.f32.vlgmr.msra.gmra.mxu0 %v24_v2  ;;  %243 = vmatmul.mubr.f32.vlgmr.msra.gmra.mxu1 %v26_v3  ;;  %v317_v44 = vld [vmem:[%s700_s4] ss:$0 sm:$0xff] }
  0x26   :  { %172 = vmatprep.mubr.f32.mxu0 %v29_v4  ;;  %247 = vmatprep.mubr.f32.mxu1 %v31_v5  ;;  %v318_v46 = vld [vmem:[%s701_s5] ss:$0 sm:$0xff] }
  0x29   :  { %173 = vmatmul.mubr.f32.gmra.mxu0 %v28_v6  ;;  %248 = vmatmul.mubr.f32.gmra.mxu1 %v30_v7 }
  0xe5   :  { %v351_v8 = vpop.f32.mrf.mxu0  ;;  %v389_v9 = vpop.f32.mrf.mxu1 }
  0xe7   :  { %v352_v11 = vpop.f32.mrf.mxu0  ;;  %v390_v12 = vpop.f32.mrf.mxu1 }
  0xe8   :  { %v353_v13 = vadd.f32 %v352_v11, %v351_v8  ;;  %v391_v17 = vadd.f32 %v390_v12, %v389_v9 }
  0xe9   :  { %v354_v14 = vpop.f32.mrf.mxu0  ;;  %v392_v15 = vpop.f32.mrf.mxu1 }
  0xea   :  { %v170_v16 = vadd.f32 %v353_v13, %v316_v10 }
  0xeb   :  { %v355_v18 = vpop.f32.mrf.mxu0  ;;  %v393_v19 = vpop.f32.mrf.mxu1 }
  0xec   :  { %v245_v21 = vadd.f32 %v391_v17, %v170_v16  ;;  %v356_v22 = vadd.f32 %v355_v18, %v354_v14  ;;  %v394_v24 = vadd.f32 %v393_v19, %v392_v15 }
  0xee   :  { %v175_v23 = vadd.f32 %v356_v22, %v316_v10  ;;  %v255_v25 = vadd.f32 %v253_v20, %v245_v21 }
  0xf0   :  { %v250_v27 = vadd.f32 %v394_v24, %v175_v23  ;;  %257 = vadd.xlane.f32.xlu0 %v255_v25 }
  0xf2   :  { %v256_v28 = vadd.f32 %v254_v26, %v250_v27 }
  0xf4   :  { %259 = vadd.xlane.f32.xlu0 %v256_v28 }
 0x179   :  { %v258_v29 = vpop.xlane.xlu0 %257 }
 0x17a   :  { %v262_v30 = vmul.f32 0.0078125, %v258_v29 }
 0x17c   :  { %v264_v31 = vsub.f32 %v255_v25, %v262_v30 }
 0x17d   :  { %v260_v32 = vpop.xlane.xlu0 %259 }
 0x17e   :  { %v263_v33 = vmul.f32 0.0078125, %v260_v32  ;;  %v266_v34 = vmul.f32 %v264_v31, %v264_v31 }
 0x180   :  { %v265_v35 = vsub.f32 %v256_v28, %v263_v33  ;;  %268 = vadd.xlane.f32.xlu1 %v266_v34 }
 0x182   :  { %v267_v36 = vmul.f32 %v265_v35, %v265_v35 }
 0x184   :  { %270 = vadd.xlane.f32.xlu1 %v267_v36 }
 0x209   :  { %v269_v37 = vpop.xlane.xlu1 %268 }
 0x20a   :  { %v272_v38 = vmul.f32 0.0078125, %v269_v37 }
 0x20c   :  { %v276_v39 = vadd.f32 1e-12, %v272_v38 }
 0x20d   :  { %v271_v40 = vpop.xlane.xlu1 %270 }
 0x20e   :  { %398 = vrsqrt.f32 %v276_v39  ;;  %v273_v41 = vmul.f32 0.0078125, %v271_v40 }
 0x210   :  { %v277_v42 = vadd.f32 1e-12, %v273_v41 }
 0x212   :  { %400 = vrsqrt.f32 %v277_v42 }
 0x21b   :  { %v399_v43 = vpop.eup %398 }
 0x21c   :  { %v280_v45 = vmul.f32 %v399_v43, %v264_v31 }
 0x21e   :  { %v288_v47 = vmul.f32 %v317_v44, %v280_v45 }
 0x21f   :  { %v401_v48 = vpop.eup %400 }
 0x220   :  { %v281_v49 = vmul.f32 %v401_v48, %v265_v35  ;;  %v296_v50 = vadd.f32 %v318_v46, %v288_v47 }
 0x222   :  { %v289_v51 = vmul.f32 %v317_v44, %v281_v49  ;;  %298 = vst [vmem:[#allocation2] sm:$0xff] %v296_v50 }
 0x224   :  { %v297_v52 = vadd.f32 %v318_v46, %v289_v51 }
 0x226   :  { %299 = vst [vmem:[#allocation2 + $0x8] sm:$0xff] %v297_v52 }
 0x227   :  { %413 = shalt.err (!%p410_p4)
}
 0x228   :  { %s425_s4 = smov 128   ;;  %s426_s5 = smov 8  }
 0x229   :  { %311 = dma.vmem_to_hbm [thread:$0]  %s306_s28, 256, %s702_s6, [#allocation3], %s425_s4, %s425_s4, %s426_s5  }
 0x22a   :  { %422 = dma.done.wait [#allocation3], 256  }
 0x22b   :  { %423 = vsyncadd [#allocation3], 4294967040 }
 0x22c   :  { %315 = vsyncpa [#allocation3], 1 }

</bundles_post_ra>
